<compile_context>
chip_gen: v6e
topology: v6e:2x2x1
jax: 0.10.0
libtpu: 0.0.40
codegen_flags: <defaults>
</compile_context>

<pallas_src>
import functools

import jax
import jax.numpy as jnp
from jax import lax
from jax.experimental import pallas as pl
from jax.experimental.pallas import tpu as pltpu

_TWO_PI = 6.283185307179586
_LANE = 128
_COL_CANDIDATES = (2048, 1024, 512, 256, 128)
_TARGET_BLOCK_ELEMS = 256 * 1024  # ~1 MiB of f32 per tile per buffer

_DEFAULT_BACKEND_IS_TPU = jax.default_backend() == "tpu"


def _plan(total):
    """Pick a lane-dense (rows, cols) view and a row-tile size for the flat tensor."""
    cols = _LANE
    for c in _COL_CANDIDATES:
        if total % c == 0:
            cols = c
            break
    rows = -(-total // cols)                      # ceil
    max_block_rows = max(8, _TARGET_BLOCK_ELEMS // cols)   # always a multiple of 8
    block_rows = rows if rows <= max_block_rows else max_block_rows
    padded_rows = -(-rows // block_rows) * block_rows
    return cols, block_rows, padded_rows


def _to_uint32(bits):
    if bits.dtype == jnp.uint32:
        return bits
    return pltpu.bitcast(bits, jnp.uint32)


def _fmix32(x):
    """murmur3 finalizer: full-avalanche 32-bit mix (uint32 in, uint32 out)."""
    x = x ^ (x >> 16)
    x = x * jnp.uint32(0x85EBCA6B)
    x = x ^ (x >> 13)
    x = x * jnp.uint32(0xC2B2AE35)
    x = x ^ (x >> 16)
    return x


def _top24_to_f32(bits):
    """Top 24 bits of a uint32 -> float32 value in [0, 2^24)."""
    return (bits >> 8).astype(jnp.int32).astype(jnp.float32)


def _gaussian_noise_kernel(seed_ref, sigma_ref, x_ref, o_ref, *, use_hw_prng):
    bm, bc = x_ref.shape
    hc = bc // 2
    pid = pl.program_id(0)

    if use_hw_prng:
        # TPU hardware PRNG, re-seeded per grid step so every tile differs.
        pltpu.prng_seed(seed_ref[0], pid)
        bits1 = _to_uint32(pltpu.prng_random_bits((bm, hc)))
        bits2 = _to_uint32(pltpu.prng_random_bits((bm, hc)))
    else:
        # Portable counter-based PRNG (standard lax/jnp ops only): globally unique
        # counters per element pair, hashed with seed-derived keys.
        row = lax.broadcasted_iota(jnp.int32, (bm, hc), 0)
        col = lax.broadcasted_iota(jnp.int32, (bm, hc), 1)
        ctr = (pid * (bm * hc) + row * hc + col).astype(jnp.uint32)
        seed_u = seed_ref[0].astype(jnp.uint32)
        k1 = seed_u * jnp.uint32(0x9E3779B9) + jnp.uint32(0x85EBCA6B)
        k2 = seed_u * jnp.uint32(0xC2B2AE35) + jnp.uint32(0x27D4EB2F)
        bits1 = _fmix32(ctr ^ k1)
        bits2 = _fmix32(ctr ^ k2)

    # Uniforms from the top 24 bits: u1 in (0, 1] (safe for log), u2 in [0, 1).
    inv24 = jnp.float32(1.0 / 16777216.0)
    u1 = (_top24_to_f32(bits1) + 1.0) * inv24
    u2 = _top24_to_f32(bits2) * inv24

    # Dual-output Box-Muller: both branches used -> 2 normals per (u1, u2) pair.
    r = jnp.sqrt(-2.0 * jnp.log(u1))
    theta = jnp.float32(_TWO_PI) * u2
    sigma = sigma_ref[0]

    # y = x + sigma * z  (identity linear_op); cast AFTER the add.
    o_ref[:, :hc] = (x_ref[:, :hc] + sigma * (r * jnp.cos(theta))).astype(o_ref.dtype)
    o_ref[:, hc:] = (x_ref[:, hc:] + sigma * (r * jnp.sin(theta))).astype(o_ref.dtype)


def correlated_gaussian_noise(x, sigma=0.1, seed=0, use_hw_prng=None):
    """y = x + N(0, sigma^2) noise, noise generated on-chip, streamed in tiles."""
    if use_hw_prng is None:
        use_hw_prng = _DEFAULT_BACKEND_IS_TPU

    orig_shape = x.shape
    total = int(x.size)
    cols, block_rows, padded_rows = _plan(total)
    pad = padded_rows * cols - total

    xf = x.reshape(-1)
    if pad:
        xf = jnp.pad(xf, (0, pad))
    x2d = xf.reshape(padded_rows, cols)
    num_blocks = padded_rows // block_rows

    seed_arr = jnp.reshape(jnp.asarray(seed, jnp.int32), (1,))
    sigma_arr = jnp.reshape(jnp.asarray(sigma, jnp.float32), (1,))

    out2d = pl.pallas_call(
        functools.partial(_gaussian_noise_kernel, use_hw_prng=use_hw_prng),
        out_shape=jax.ShapeDtypeStruct((padded_rows, cols), x.dtype),
        grid=(num_blocks,),
        in_specs=[
            pl.BlockSpec(memory_space=pltpu.MemorySpace.SMEM),   # seed scalar
            pl.BlockSpec(memory_space=pltpu.MemorySpace.SMEM),   # sigma scalar
            pl.BlockSpec((block_rows, cols), lambda i: (i, 0)),  # x tile (pipelined)
        ],
        out_specs=pl.BlockSpec((block_rows, cols), lambda i: (i, 0)),
        compiler_params=pltpu.CompilerParams(dimension_semantics=("parallel",)),
    )(seed_arr, sigma_arr, x2d)

    out = out2d.reshape(-1)
    if pad:
        out = out[:total]
    return out.reshape(orig_shape)


class CorrelatedGaussianNoise:
    """Mirror of the PyTorch module (identity linear_op only)."""

    def __init__(self, sigma=0.1, linear_op=None, seed=0):
        self.sigma = sigma
        self.seed = seed
        self.linear_op = linear_op  # TODO(synk): non-identity linear_op not supported in-kernel.

    def update_parameters(self, sigma=None, **kwargs):
        if sigma is not None:
            self.sigma = sigma

    def __call__(self, x, sigma=None, **kwargs):
        self.update_parameters(sigma)
        return correlated_gaussian_noise(x, sigma=self.sigma, seed=self.seed)


if __name__ == "__main__":
    key = jax.random.PRNGKey(0)
    x = jax.random.uniform(key, (2, 4, 16, 16), dtype=jnp.float32)  # NCHW

    noise_model = CorrelatedGaussianNoise(sigma=0.1, seed=0)
    y = noise_model(x)
    y = jax.block_until_ready(y)

    # sanity: same shape/dtype, finite, perturbation on the order of sigma
    assert y.shape == x.shape and y.dtype == x.dtype
    resid = y - x
    assert bool(jnp.isfinite(resid).all())
    assert float(jnp.abs(resid).max()) < 1.0          # |sigma * z| <= 0.1 * 5.77

    # loose distribution sanity for the added noise
    mean = float(jnp.mean(resid))
    std = float(jnp.std(resid))
    assert abs(mean) < 0.05 and 0.04 < std < 0.2

    print("KERNEL_OK")
</pallas_src>

<mosaic_0001>
module attributes {stable_mosaic.version = 11 : i64} {
  func.func @_gaussian_noise_kernel(%arg0: i32, %arg1: memref<1xi32, #tpu.memory_space<smem>>, %arg2: memref<1xf32, #tpu.memory_space<smem>>, %arg3: memref<1x2048xf32, #tpu.memory_space<vmem>>, %arg4: memref<1x2048xf32, #tpu.memory_space<vmem>>) attributes {dimension_semantics = [#tpu.dimension_semantics<parallel>], iteration_bounds = array<i64: 1>, scalar_prefetch = 0 : i64, scratch_operands = 0 : i64, tpu.core_type = #tpu.core_type<tc>, window_params = [{transform_indices = @transform_0, window_bounds = array<i64: 1>}, {transform_indices = @transform_1, window_bounds = array<i64: 1>}, {transform_indices = @transform_2, window_bounds = array<i64: 1, 2048>}, {transform_indices = @transform_3, window_bounds = array<i64: 1, 2048>}]} {
    %0 = tpu.iota {dimensions = array<i32: 0>} : vector<1x1024xi32>
    %1 = tpu.iota {dimensions = array<i32: 1>} : vector<1x1024xi32>
    %c1024_i32 = arith.constant 1024 : i32
    %2 = arith.muli %arg0, %c1024_i32 : i32
    %c1024_i32_0 = arith.constant 1024 : i32
    %3 = vector.broadcast %c1024_i32_0 : i32 to vector<1x1024xi32>
    %4 = arith.muli %0, %3 : vector<1x1024xi32>
    %5 = vector.broadcast %2 : i32 to vector<1x1024xi32>
    %6 = arith.addi %5, %4 : vector<1x1024xi32>
    %7 = arith.addi %6, %1 : vector<1x1024xi32>
    %c0 = arith.constant 0 : index
    %8 = memref.load %arg1[%c0] : memref<1xi32, #tpu.memory_space<smem>>
    %c-1640531527_i32 = arith.constant -1640531527 : i32
    %9 = arith.muli %8, %c-1640531527_i32 : i32
    %c-2048144789_i32 = arith.constant -2048144789 : i32
    %10 = arith.addi %9, %c-2048144789_i32 : i32
    %c-1028477387_i32 = arith.constant -1028477387 : i32
    %11 = arith.muli %8, %c-1028477387_i32 : i32
    %c668265263_i32 = arith.constant 668265263 : i32
    %12 = arith.addi %11, %c668265263_i32 : i32
    %13 = vector.broadcast %10 : i32 to vector<1x1024xi32>
    %14 = arith.xori %7, %13 : vector<1x1024xi32>
    %c16_i32 = arith.constant 16 : i32
    %15 = vector.broadcast %c16_i32 : i32 to vector<1x1024xi32>
    %16 = arith.shrui %14, %15 : vector<1x1024xi32>
    %17 = arith.xori %14, %16 : vector<1x1024xi32>
    %c-2048144789_i32_1 = arith.constant -2048144789 : i32
    %18 = vector.broadcast %c-2048144789_i32_1 : i32 to vector<1x1024xi32>
    %19 = arith.muli %17, %18 : vector<1x1024xi32>
    %c13_i32 = arith.constant 13 : i32
    %20 = vector.broadcast %c13_i32 : i32 to vector<1x1024xi32>
    %21 = arith.shrui %19, %20 : vector<1x1024xi32>
    %22 = arith.xori %19, %21 : vector<1x1024xi32>
    %c-1028477387_i32_2 = arith.constant -1028477387 : i32
    %23 = vector.broadcast %c-1028477387_i32_2 : i32 to vector<1x1024xi32>
    %24 = arith.muli %22, %23 : vector<1x1024xi32>
    %c16_i32_3 = arith.constant 16 : i32
    %25 = vector.broadcast %c16_i32_3 : i32 to vector<1x1024xi32>
    %26 = arith.shrui %24, %25 : vector<1x1024xi32>
    %27 = arith.xori %24, %26 : vector<1x1024xi32>
    %28 = vector.broadcast %12 : i32 to vector<1x1024xi32>
    %29 = arith.xori %7, %28 : vector<1x1024xi32>
    %c16_i32_4 = arith.constant 16 : i32
    %30 = vector.broadcast %c16_i32_4 : i32 to vector<1x1024xi32>
    %31 = arith.shrui %29, %30 : vector<1x1024xi32>
    %32 = arith.xori %29, %31 : vector<1x1024xi32>
    %c-2048144789_i32_5 = arith.constant -2048144789 : i32
    %33 = vector.broadcast %c-2048144789_i32_5 : i32 to vector<1x1024xi32>
    %34 = arith.muli %32, %33 : vector<1x1024xi32>
    %c13_i32_6 = arith.constant 13 : i32
    %35 = vector.broadcast %c13_i32_6 : i32 to vector<1x1024xi32>
    %36 = arith.shrui %34, %35 : vector<1x1024xi32>
    %37 = arith.xori %34, %36 : vector<1x1024xi32>
    %c-1028477387_i32_7 = arith.constant -1028477387 : i32
    %38 = vector.broadcast %c-1028477387_i32_7 : i32 to vector<1x1024xi32>
    %39 = arith.muli %37, %38 : vector<1x1024xi32>
    %c16_i32_8 = arith.constant 16 : i32
    %40 = vector.broadcast %c16_i32_8 : i32 to vector<1x1024xi32>
    %41 = arith.shrui %39, %40 : vector<1x1024xi32>
    %42 = arith.xori %39, %41 : vector<1x1024xi32>
    %c8_i32 = arith.constant 8 : i32
    %43 = vector.broadcast %c8_i32 : i32 to vector<1x1024xi32>
    %44 = arith.shrui %27, %43 : vector<1x1024xi32>
    %45 = arith.sitofp %44 : vector<1x1024xi32> to vector<1x1024xf32>
    %cst = arith.constant 1.000000e+00 : f32
    %46 = vector.broadcast %cst : f32 to vector<1x1024xf32>
    %47 = arith.addf %45, %46 : vector<1x1024xf32>
    %cst_9 = arith.constant 5.96046448E-8 : f32
    %48 = vector.broadcast %cst_9 : f32 to vector<1x1024xf32>
    %49 = arith.mulf %47, %48 : vector<1x1024xf32>
    %c8_i32_10 = arith.constant 8 : i32
    %50 = vector.broadcast %c8_i32_10 : i32 to vector<1x1024xi32>
    %51 = arith.shrui %42, %50 : vector<1x1024xi32>
    %52 = arith.sitofp %51 : vector<1x1024xi32> to vector<1x1024xf32>
    %cst_11 = arith.constant 5.96046448E-8 : f32
    %53 = vector.broadcast %cst_11 : f32 to vector<1x1024xf32>
    %54 = arith.mulf %52, %53 : vector<1x1024xf32>
    %55 = math.log %49 : vector<1x1024xf32>
    %cst_12 = arith.constant -2.000000e+00 : f32
    %56 = vector.broadcast %cst_12 : f32 to vector<1x1024xf32>
    %57 = arith.mulf %56, %55 : vector<1x1024xf32>
    %58 = math.sqrt %57 : vector<1x1024xf32>
    %cst_13 = arith.constant 6.28318548 : f32
    %59 = vector.broadcast %cst_13 : f32 to vector<1x1024xf32>
    %60 = arith.mulf %59, %54 : vector<1x1024xf32>
    %c0_14 = arith.constant 0 : index
    %61 = memref.load %arg2[%c0_14] : memref<1xf32, #tpu.memory_space<smem>>
    %c0_15 = arith.constant 0 : index
    %c0_16 = arith.constant 0 : index
    %62 = vector.load %arg3[%c0_15, %c0_16] : memref<1x2048xf32, #tpu.memory_space<vmem>>, vector<1x1024xf32>
    %63 = math.cos %60 : vector<1x1024xf32>
    %64 = arith.mulf %58, %63 : vector<1x1024xf32>
    %65 = vector.broadcast %61 : f32 to vector<1x1024xf32>
    %66 = arith.mulf %65, %64 : vector<1x1024xf32>
    %67 = arith.addf %62, %66 : vector<1x1024xf32>
    %c0_17 = arith.constant 0 : index
    %c0_18 = arith.constant 0 : index
    %68 = vector.load %arg4[%c0_17, %c0_18] : memref<1x2048xf32, #tpu.memory_space<vmem>>, vector<1x1024xf32>
    tpu.vector_store %arg4[%c0_17, %c0_18], %67 {strides = array<i32>} : memref<1x2048xf32, #tpu.memory_space<vmem>>, vector<1x1024xf32>,
    %c0_19 = arith.constant 0 : index
    %c1024 = arith.constant 1024 : index
    %69 = vector.load %arg3[%c0_19, %c1024] : memref<1x2048xf32, #tpu.memory_space<vmem>>, vector<1x1024xf32>
    %70 = math.sin %60 : vector<1x1024xf32>
    %71 = arith.mulf %58, %70 : vector<1x1024xf32>
    %72 = vector.broadcast %61 : f32 to vector<1x1024xf32>
    %73 = arith.mulf %72, %71 : vector<1x1024xf32>
    %74 = arith.addf %69, %73 : vector<1x1024xf32>
    %c0_20 = arith.constant 0 : index
    %c1024_21 = arith.constant 1024 : index
    %75 = vector.load %arg4[%c0_20, %c1024_21] : memref<1x2048xf32, #tpu.memory_space<vmem>>, vector<1x1024xf32>
    tpu.vector_store %arg4[%c0_20, %c1024_21], %74 {strides = array<i32>} : memref<1x2048xf32, #tpu.memory_space<vmem>>, vector<1x1024xf32>,
    return
  }
  func.func @transform_0(%arg0: i32) -> i32 {
    %c0_i32 = arith.constant 0 : i32
    %c0_i32_0 = arith.constant 0 : i32
    return %c0_i32 : i32
  }
  func.func @transform_1(%arg0: i32) -> i32 {
    %c0_i32 = arith.constant 0 : i32
    %c0_i32_0 = arith.constant 0 : i32
    return %c0_i32 : i32
  }
  func.func @transform_2(%arg0: i32) -> (i32, i32) {
    %c0_i32 = arith.constant 0 : i32
    %c0_i32_0 = arith.constant 0 : i32
    return %arg0, %c0_i32 : i32, i32
  }
  func.func @transform_3(%arg0: i32) -> (i32, i32) {
    %c0_i32 = arith.constant 0 : i32
    %c0_i32_0 = arith.constant 0 : i32
    return %arg0, %c0_i32 : i32, i32
  }
}

</mosaic_0001>

<bundles_post_ra>
// kernel: tpu_custom_call.1
= control target key start
LH: loop header
LB: loop body
LE: loop exit
PB: predicated region body
PF: predicated region fallthrough
CT: control target
= control target key end

     0   :  { %10 = vsyncpa [#allocation5], 0  ;;  %s3591_s0 = inlined_call_operand.<no memory space> [shape: s32[1], index: 0, kind: input, shape index: {}]   ;;  %s3592_s1 = inlined_call_operand.<no memory space> [shape: f32[1], index: 1, kind: input, shape index: {}]   ;;  %s3593_s2 = inlined_call_operand.hbm [shape: f32[1,2048], index: 2, kind: input, shape index: {}]   ;;  %s3594_s3 = inlined_call_operand.hbm [shape: f32[1,2048], index: 3, kind: output, shape index: {}]  }
   0x1   :  { %11 = vsyncpa [#allocation6], 0  ;;  %s2387_s12 = smov [#allocation4]  }
   0x2   :  { %s22_s13 = sshll.u32 %s2387_s12, 4  ;;  %s23_s13 = int_to_ptr.vmem [resolvable:$true] %s22_s13 }
   0x3   :  { %s2351_s14 = scalar_lea.vmem %s23_s13, 256  ;;  %p2356_p1 = scmp.lt.s32.totalorder %s23_s13, %s23_s13 }
   0x4   :  { %p2352_p0 = scmp.ne.s32.totalorder %s23_s13, %s2351_s14  ;;  %p2357_p2 = scmp.lt.s32.totalorder %s2351_s14, %s2351_s14 }
   0x6   :  { %p2358_p3 = por %p2357_p2, %p2356_p1 }
   0x8   :  { %p2359_p4 = pnand %p2358_p3, %p2352_p0 }
   0xa   :  { %2362 = shalt.err (!%p2359_p4)
}
   0xb   :  { %25 = dma.hbm_to_vmem [thread:$0]  %s3593_s2, 256, %s23_s13, [#allocation5]  }
   0xc   :  { %2383 = dma.done.wait [#allocation5], 256  }
   0xd   :  { %2384 = vsyncadd [#allocation5], 4294967040  ;;  %v29_v0 = vlaneseq  ;;  %s55_s19 = smul.u32 3266489909, %s3591_s0 }
   0xe   :  { %s53_s22 = smul.u32 2654435769, %s3591_s0 }
   0xf   :  { %v2419_v1 = vshrl.u32 %v29_v0, 7  ;;  %v32_v2 = vand.u32 127, %v29_v0  ;;  %s56_s20 = sadd.s32 668265263, %s55_s19 }
  0x10   :  { %v2425_v7 = vstv %s56_s20  ;;  %s54_s23 = sadd.s32 2246822507, %s53_s22 }
  0x11   :  { %3629 = vst [vmem:[#allocation10_spill] sm:$0xff] %v2419_v1  ;;  %v33_v3 = vadd.s32 128, %v32_v2  ;;  %v41_v4 = vmul.u32 1024, %v2419_v1  ;;  %v57_v12 = vstv %s54_s23  ;;  %v34_v15 = vadd.s32 256, %v32_v2 }
  0x12   :  { %v35_v16 = vadd.s32 384, %v32_v2  ;;  %v36_v17 = vadd.s32 512, %v32_v2  ;;  %v37_v19 = vadd.s32 640, %v32_v2  ;;  %v38_v20 = vadd.s32 768, %v32_v2 }
  0x13   :  { %v44_v5 = vadd.s32 %v41_v4, %v32_v2  ;;  %v45_v6 = vadd.s32 %v41_v4, %v33_v3  ;;  %v39_v22 = vadd.s32 896, %v32_v2  ;;  %v46_v25 = vadd.s32 %v41_v4, %v34_v15 }
  0x14   :  { %v47_v27 = vadd.s32 %v41_v4, %v35_v16  ;;  %v48_v28 = vadd.s32 %v41_v4, %v36_v17  ;;  %v49_v30 = vadd.s32 %v41_v4, %v37_v19  ;;  %v50_v31 = vadd.s32 %v41_v4, %v38_v20 }
  0x15   :  { %v131_v8 = vxor.u32 %v2425_v7, %v44_v5  ;;  %v132_v9 = vxor.u32 %v2425_v7, %v45_v6  ;;  %v58_v21 = vxor.u32 %v57_v12, %v44_v5  ;;  %v59_v26 = vxor.u32 %v57_v12, %v45_v6 }
  0x16   :  { %v60_v32 = vxor.u32 %v57_v12, %v46_v25  ;;  %v51_v34 = vadd.s32 %v41_v4, %v39_v22  ;;  %v61_v35 = vxor.u32 %v57_v12, %v47_v27  ;;  %v62_v36 = vxor.u32 %v57_v12, %v48_v28 }
  0x17   :  { %v139_v10 = vshrl.u32 %v131_v8, 16  ;;  %v140_v11 = vshrl.u32 %v132_v9, 16  ;;  %v66_v33 = vshrl.u32 %v58_v21, 16  ;;  %v63_v38 = vxor.u32 %v57_v12, %v49_v30 }
  0x18   :  { %v64_v39 = vxor.u32 %v57_v12, %v50_v31  ;;  %v67_v40 = vshrl.u32 %v59_v26, 16  ;;  %v65_v41 = vxor.u32 %v57_v12, %v51_v34  ;;  %v68_v43 = vshrl.u32 %v60_v32, 16 }
  0x19   :  { %v147_v13 = vxor.u32 %v139_v10, %v131_v8  ;;  %v148_v14 = vxor.u32 %v140_v11, %v132_v9  ;;  %v74_v44 = vxor.u32 %v66_v33, %v58_v21  ;;  %v133_v45 = vxor.u32 %v2425_v7, %v46_v25 }
  0x1a   :  { %v69_v46 = vshrl.u32 %v61_v35, 16  ;;  %v70_v47 = vshrl.u32 %v62_v36, 16  ;;  %v71_v49 = vshrl.u32 %v63_v38, 16  ;;  %v72_v50 = vshrl.u32 %v64_v39, 16 }
  0x1b   :  { %v155_v18 = vmul.u32 2246822507, %v147_v13  ;;  %v156_v23 = vmul.u32 2246822507, %v148_v14  ;;  %v75_v51 = vxor.u32 %v67_v40, %v59_v26  ;;  %v73_v52 = vshrl.u32 %v65_v41, 16 }
  0x1c   :  { %v76_v54 = vxor.u32 %v68_v43, %v60_v32  ;;  %v82_v55 = vmul.u32 2246822507, %v74_v44  ;;  %v134_v56 = vxor.u32 %v2425_v7, %v47_v27  ;;  %v141_v57 = vshrl.u32 %v133_v45, 16 }
  0x1d   :  { %v163_v24 = vshrl.u32 %v155_v18, 13  ;;  %v164_v37 = vshrl.u32 %v156_v23, 13  ;;  %v77_v58 = vxor.u32 %v69_v46, %v61_v35  ;;  %v78_v59 = vxor.u32 %v70_v47, %v62_v36 }
  0x1e   :  { %v135_v60 = vxor.u32 %v2425_v7, %v48_v28  ;;  %v79_v62 = vxor.u32 %v71_v49, %v63_v38  ;;  %v80_v63 = vxor.u32 %v72_v50, %v64_v39  ;;  %v83_v0 = vmul.u32 2246822507, %v75_v51 }
  0x1f   :  { %v171_v29 = vxor.u32 %v163_v24, %v155_v18  ;;  %v172_v48 = vxor.u32 %v164_v37, %v156_v23  ;;  %v136_v2 = vxor.u32 %v2425_v7, %v49_v30  ;;  %v81_v3 = vxor.u32 %v73_v52, %v65_v41 }
  0x20   :  { %v137_v4 = vxor.u32 %v2425_v7, %v50_v31  ;;  %v138_v5 = vxor.u32 %v2425_v7, %v51_v34  ;;  %v84_v8 = vmul.u32 2246822507, %v76_v54  ;;  %v90_v9 = vshrl.u32 %v82_v55, 13 }
  0x21   :  { %v179_v42 = vmul.u32 3266489909, %v171_v29  ;;  %v180_v61 = vmul.u32 3266489909, %v172_v48  ;;  %v142_v10 = vshrl.u32 %v134_v56, 16  ;;  %v149_v11 = vxor.u32 %v141_v57, %v133_v45 }
  0x22   :  { %v85_v12 = vmul.u32 2246822507, %v77_v58  ;;  %v86_v13 = vmul.u32 2246822507, %v78_v59  ;;  %v143_v14 = vshrl.u32 %v135_v60, 16  ;;  %v91_v18 = vshrl.u32 %v83_v0, 13 }
  0x23   :  { %v187_v53 = vshrl.u32 %v179_v42, 16  ;;  %v188_v15 = vshrl.u32 %v180_v61, 16  ;;  %v87_v16 = vmul.u32 2246822507, %v79_v62  ;;  %v88_v17 = vmul.u32 2246822507, %v80_v63 }
  0x24   :  { %v144_v19 = vshrl.u32 %v136_v2, 16  ;;  %v89_v20 = vmul.u32 2246822507, %v81_v3  ;;  %v145_v21 = vshrl.u32 %v137_v4, 16  ;;  %v146_v22 = vshrl.u32 %v138_v5, 16 }
  0x25   :  { %v195_v6 = vxor.u32 %v187_v53, %v179_v42  ;;  %v92_v24 = vshrl.u32 %v84_v8, 13  ;;  %v2438_v25 = vxor.u32 %v90_v9, %v82_v55  ;;  %v150_v7 = vxor.u32 %v142_v10, %v134_v56 }
  0x26   :  { %v157_v26 = vmul.u32 2246822507, %v149_v11  ;;  %v93_v27 = vshrl.u32 %v85_v12, 13  ;;  %v151_v28 = vxor.u32 %v143_v14, %v135_v60  ;;  %v196_v29 = vxor.u32 %v188_v15, %v180_v61 }
  0x27   :  { %v235_v23 = vshrl.u32 %v195_v6, 8  ;;  %v94_v31 = vshrl.u32 %v86_v13, 13  ;;  %v95_v32 = vshrl.u32 %v87_v16, 13  ;;  %v99_v33 = vxor.u32 %v91_v18, %v83_v0 }
  0x28   :  { %v152_v34 = vxor.u32 %v144_v19, %v136_v2  ;;  %v96_v35 = vshrl.u32 %v88_v17, 13  ;;  %v153_v36 = vxor.u32 %v145_v21, %v137_v4  ;;  %v154_v37 = vxor.u32 %v146_v22, %v138_v5 }
  0x29   :  { %v243_v30 = vcvt.s32.f32 %v235_v23  ;;  %v97_v39 = vshrl.u32 %v89_v20, 13  ;;  %v106_v40 = vmul.u32 3266489909, %v2438_v25  ;;  %v158_v41 = vmul.u32 2246822507, %v150_v7 }
  0x2a   :  { %v165_v42 = vshrl.u32 %v157_v26, 13  ;;  %v100_v43 = vxor.u32 %v92_v24, %v84_v8  ;;  %v159_v44 = vmul.u32 2246822507, %v151_v28  ;;  %v236_v45 = vshrl.u32 %v196_v29, 8 }
  0x2b   :  { %v251_v38 = vmul.f32 5.9604645e-08, %v243_v30  ;;  %v101_v47 = vxor.u32 %v93_v27, %v85_v12  ;;  %v102_v48 = vxor.u32 %v94_v31, %v86_v13  ;;  %v107_v49 = vmul.u32 3266489909, %v99_v33 }
  0x2c   :  { %v160_v50 = vmul.u32 2246822507, %v152_v34  ;;  %v103_v51 = vxor.u32 %v95_v32, %v87_v16  ;;  %v161_v52 = vmul.u32 2246822507, %v153_v36  ;;  %v104_v54 = vxor.u32 %v96_v35, %v88_v17 }
  0x2d   :  { %v2441_v46 = vmul.f32 6.2831855, %v251_v38  ;;  %v162_v53 = vmul.u32 2246822507, %v154_v37  ;;  %v166_v55 = vshrl.u32 %v158_v41, 13  ;;  %v173_v56 = vxor.u32 %v165_v42, %v157_v26 }
  0x2e   :  { %v105_v58 = vxor.u32 %v97_v39, %v89_v20  ;;  %v108_v59 = vmul.u32 3266489909, %v100_v43  ;;  %v167_v60 = vshrl.u32 %v159_v44, 13  ;;  %v244_v61 = vcvt.s32.f32 %v236_v45 }
  0x2f   :  { %v352_v57 = vand.u32 2139095040, %v2441_v46  ;;  %v109_v62 = vmul.u32 3266489909, %v101_v47  ;;  %v110_v63 = vmul.u32 3266489909, %v102_v48  ;;  %v168_v0 = vshrl.u32 %v160_v50, 13 }
  0x30   :  { %v111_v3 = vmul.u32 3266489909, %v103_v51  ;;  %v114_v4 = vshrl.u32 %v106_v40, 16  ;;  %v169_v5 = vshrl.u32 %v161_v52, 13  ;;  %v170_v6 = vshrl.u32 %v162_v53, 13 }
  0x31   :  { %v353_v2 = vshrl.u32 %v352_v57, 23  ;;  %v115_v8 = vshrl.u32 %v107_v49, 16  ;;  %v174_v9 = vxor.u32 %v166_v55, %v158_v41  ;;  %v181_v10 = vmul.u32 3266489909, %v173_v56 }
  0x32   :  { %v112_v12 = vmul.u32 3266489909, %v104_v54  ;;  %v113_v13 = vmul.u32 3266489909, %v105_v58  ;;  %v175_v14 = vxor.u32 %v167_v60, %v159_v44  ;;  %v252_v15 = vmul.f32 5.9604645e-08, %v244_v61 }
  0x33   :  { %v2174_v11 = vadd.s32 4294967169, %v353_v2  ;;  %v116_v16 = vshrl.u32 %v108_v59, 16  ;;  %v117_v17 = vshrl.u32 %v109_v62, 16  ;;  %v176_v18 = vxor.u32 %v168_v0, %v160_v50 }
  0x34   :  { %v118_v20 = vshrl.u32 %v110_v63, 16  ;;  %v119_v21 = vshrl.u32 %v111_v3, 16  ;;  %v177_v22 = vxor.u32 %v169_v5, %v161_v52  ;;  %v178_v23 = vxor.u32 %v170_v6, %v162_v53 }
  0x35   :  { %v359_v19 = vadd.s32 1, %v2174_v11  ;;  %v122_v24 = vxor.u32 %v114_v4, %v106_v40  ;;  %v182_v25 = vmul.u32 3266489909, %v174_v9  ;;  %v189_v7 = vshrl.u32 %v181_v10, 16 }
  0x36   :  { %v120_v26 = vshrl.u32 %v112_v12, 16  ;;  %v123_v27 = vxor.u32 %v115_v8, %v107_v49  ;;  %v183_v28 = vmul.u32 3266489909, %v175_v14  ;;  %v2444_v29 = vmul.f32 6.2831855, %v252_v15 }
  0x37   :  { %vm360_vm0 = vcmp.gt.s32.totalorder %v359_v19, 0  ;;  %v121_v30 = vshrl.u32 %v113_v13, 16  ;;  %v124_v31 = vxor.u32 %v116_v16, %v108_v59  ;;  %v184_v32 = vmul.u32 3266489909, %v176_v18 }
  0x38   :  { %v361_v33 = vsel %vm360_vm0, %v359_v19, 0  ;;  %v125_v34 = vxor.u32 %v117_v17, %v109_v62  ;;  %v185_v35 = vmul.u32 3266489909, %v177_v22  ;;  %v186_v36 = vmul.u32 3266489909, %v178_v23 }
  0x39   :  { %v126_v37 = vxor.u32 %v118_v20, %v110_v63  ;;  %v127_v38 = vxor.u32 %v119_v21, %v111_v3  ;;  %v190_v39 = vshrl.u32 %v182_v25, 16  ;;  %v197_v41 = vxor.u32 %v189_v7, %v181_v10 }
  0x3a   :  { %v128_v40 = vxor.u32 %v120_v26, %v112_v12  ;;  %v191_v42 = vshrl.u32 %v183_v28, 16  ;;  %v363_v43 = vand.u32 31, %v361_v33  ;;  %v455_v44 = vand.u32 2139095040, %v2444_v29 }
  0x3b   :  { %v129_v45 = vxor.u32 %v121_v30, %v113_v13  ;;  %v203_v47 = vshrl.u32 %v122_v24, 8  ;;  %v204_v48 = vshrl.u32 %v123_v27, 8  ;;  %v205_v49 = vshrl.u32 %v124_v31, 8 }
  0x3c   :  { %v192_v50 = vshrl.u32 %v184_v32, 16  ;;  %v193_v51 = vshrl.u32 %v185_v35, 16  ;;  %v194_v52 = vshrl.u32 %v186_v36, 16  ;;  %v206_v53 = vshrl.u32 %v125_v34, 8 }
  0x3d   :  { %v2447_v54 = vxor.u32 %v190_v39, %v182_v25  ;;  %v207_v55 = vshrl.u32 %v126_v37, 8  ;;  %v208_v56 = vshrl.u32 %v127_v38, 8  ;;  %v237_v57 = vshrl.u32 %v197_v41, 8 }
  0x3e   :  { %v2449_v58 = vxor.u32 %v191_v42, %v183_v28  ;;  %v349_v59 = vand.u32 2147483647, %v2441_v46  ;;  %v364_v60 = vsub.s32 32, %v363_v43  ;;  %v456_v61 = vshrl.u32 %v455_v44, 23 }
  0x3f   :  { %v209_v62 = vshrl.u32 %v128_v40, 8  ;;  %v210_v63 = vshrl.u32 %v129_v45, 8  ;;  %v211_v0 = vcvt.s32.f32 %v203_v47  ;;  %v212_v2 = vcvt.s32.f32 %v204_v48 }
  0x40   :  { %v2452_v3 = vxor.u32 %v192_v50, %v184_v32  ;;  %v2454_v4 = vxor.u32 %v193_v51, %v185_v35  ;;  %v213_v5 = vcvt.s32.f32 %v205_v49  ;;  %v214_v6 = vcvt.s32.f32 %v206_v53 }
  0x41   :  { %v2456_v8 = vxor.u32 %v194_v52, %v186_v36  ;;  %v215_v9 = vcvt.s32.f32 %v207_v55  ;;  %v216_v10 = vcvt.s32.f32 %v208_v56  ;;  %v245_v11 = vcvt.s32.f32 %v237_v57 }
  0x42   :  { %v356_v12 = vand.u32 8388607, %v349_v59  ;;  %v3612_v13 = vmov 683565275   ;;  %v3607_v15 = vmov 2475754826   ;;  %v217_v18 = vcvt.s32.f32 %v209_v62 }
  0x43   :  { %v366_v14 = vshll.u32 %v3612_v13, %v363_v43  ;;  %v367_v16 = vshrl.u32 %v3607_v15, %v364_v60  ;;  %v2178_v17 = vadd.s32 4294967169, %v456_v61  ;;  %v218_v19 = vcvt.s32.f32 %v210_v63 }
  0x44   :  { %v219_v20 = vadd.f32 1.0, %v211_v0  ;;  %v220_v21 = vadd.f32 1.0, %v212_v2  ;;  %v221_v22 = vadd.f32 1.0, %v213_v5  ;;  %v222_v23 = vadd.f32 1.0, %v214_v6 }
  0x45   :  { %v362_v24 = vshrl.u32 %v361_v33, 5  ;;  %v369_v25 = vshll.u32 %v3607_v15, %v363_v43  ;;  %v223_v7 = vadd.f32 1.0, %v215_v9  ;;  %v253_v26 = vmul.f32 5.9604645e-08, %v245_v11 }
  0x46   :  { %v3605_v27 = vmov 2131351028   ;;  %v3602_v30 = vmov 2102212464   ;;  %v357_v32 = vor.u32 8388608, %v356_v12  ;;  %v368_v34 = vor.u32 %v367_v16, %v366_v14 }
  0x47   :  { %v372_v28 = vshll.u32 %v3605_v27, %v363_v43  ;;  %v375_v31 = vshll.u32 %v3602_v30, %v363_v43  ;;  %v370_v35 = vshrl.u32 %v3605_v27, %v364_v60  ;;  %v462_v36 = vadd.s32 1, %v2178_v17 }
  0x48   :  { %v373_v37 = vshrl.u32 %v3602_v30, %v364_v60  ;;  %v3600_v38 = vmov 920167782   ;;  %v3598_v41 = vmov 1326507024   ;;  %v365_v42 = vshrl.u32 %v3612_v13, %v364_v60 }
  0x49   :  { %v376_v33 = vshrl.u32 %v3600_v38, %v364_v60  ;;  %v378_v39 = vshll.u32 %v3600_v38, %v363_v43  ;;  %v379_v40 = vshrl.u32 %v3598_v41, %v364_v60  ;;  %v371_v44 = vor.u32 %v370_v35, %v369_v25 }
  0x4a   :  { %vm381_vm1 = vcmp.lt.s32.totalorder %v362_v24, 1  ;;  %vm383_vm2 = vcmp.lt.s32.totalorder %v362_v24, 3  ;;  %v374_v45 = vor.u32 %v373_v37, %v372_v28  ;;  %vm384_vm3 = vcmp.lt.s32.totalorder %v362_v24, 4 }
  0x4b   :  { %v377_v47 = vor.u32 %v376_v33, %v375_v31  ;;  %v380_v48 = vor.u32 %v379_v40, %v378_v39  ;;  %vm382_vm4 = vcmp.lt.s32.totalorder %v362_v24, 2  ;;  %v389_v49 = vsel %vm381_vm1, %v368_v34, %v371_v44 }
  0x4c   :  { %v397_v50 = vshll.u32 %v357_v32, 8  ;;  %vm463_vm5 = vcmp.gt.s32.totalorder %v462_v36, 0  ;;  %v386_v51 = vsel %vm384_vm3, %v374_v45, 2102212464  ;;  %v393_v43 = vsel %vm381_vm1, %v371_v44, %v374_v45 }
  0x4d   :  { %v390_v52 = vsel %vm384_vm3, %v377_v47, 920167782  ;;  %v394_v53 = vsel %vm384_vm3, %v380_v48, 1326507024  ;;  %v224_v55 = vadd.f32 1.0, %v216_v10  ;;  %v2473_v56 = vadd.f32 1.0, %v217_v18 }
  0x4e   :  { %v391_v57 = vsel %vm383_vm2, %v374_v45, %v390_v52  ;;  %v3597_v60 = vand.u32 2147483647, %v2444_v29  ;;  %v385_v61 = vsel %vm381_vm1, %v365_v42, %v368_v34  ;;  %v387_v62 = vsel %vm383_vm2, %v371_v44, %v386_v51 }
  0x4f   :  { %v392_v63 = vsel %vm382_vm4, %v389_v49, %v391_v57  ;;  %v395_v0 = vsel %vm383_vm2, %v377_v47, %v394_v53  ;;  %v2481_v2 = vadd.f32 1.0, %v218_v19  ;;  %v2483_v5 = vmul.f32 6.2831855, %v253_v26 }
  0x50   :  { %v396_v6 = vsel %vm382_vm4, %v393_v43, %v395_v0  ;;  %v464_v9 = vsel %vm463_vm5, %v462_v36, 0  ;;  %v2487_v10 = vmul.f32 5.9604645e-08, %v219_v20  ;;  %v2489_v11 = vmul.f32 5.9604645e-08, %v220_v21 }
  0x51   :  { %v2491_v12 = vmul.u32.u64.low %v397_v50, %v396_v6  ;;  %v2492_v14 = vmul.u32.u64.high %v397_v50, %v396_v6, %v2491_v12  ;;  %v238_v16 = vshrl.u32 %v2447_v54, 8  ;;  %v388_v17 = vsel %vm382_vm4, %v385_v61, %v387_v62 }
  0x52   :  { %v2496_v18 = vmul.u32.u64.low %v397_v50, %v392_v63  ;;  %v2497_v19 = vmul.u32.u64.high %v397_v50, %v392_v63, %v2496_v18  ;;  %v2500_v25 = vmul.f32 5.9604645e-08, %v221_v22  ;;  %v239_v26 = vshrl.u32 %v2449_v58, 8 }
  0x53   :  { %v459_v20 = vand.u32 8388607, %v3597_v60  ;;  %v466_v21 = vand.u32 31, %v464_v9  ;;  %v2505_v28 = vmul.f32 5.9604645e-08, %v222_v23  ;;  %v2507_v31 = vmul.f32 5.9604645e-08, %v223_v7 }
  0x54   :  { %v2509_v32 = vmul.f32 5.9604645e-08, %v224_v55  ;;  %v558_v54 = vand.u32 2139095040, %v2483_v5  ;;  %v240_v24 = vshrl.u32 %v2452_v3, 8  ;;  %v241_v34 = vshrl.u32 %v2454_v4, 8 }
  0x55   :  { %v404_v22 = vmul.u32 %v397_v50, %v388_v17  ;;  %v2514_v35 = vshrl.u32 %v464_v9, 5  ;;  %v242_v58 = vshrl.u32 %v2456_v8, 8  ;;  %v246_v36 = vcvt.s32.f32 %v238_v16 }
  0x56   :  { %vm406_vm6 = vc.u32 %v2492_v14, %v2496_v18  ;;  %v407_v23 = vadd.s32 1, %v2497_v19  ;;  %v247_v7 = vcvt.s32.f32 %v239_v26  ;;  %v460_v37 = vor.u32 8388608, %v459_v20 }
  0x57   :  { %v467_v33 = vsub.s32 32, %v466_v21  ;;  %v469_v39 = vshll.u32 %v3612_v13, %v466_v21  ;;  %v472_v4 = vshll.u32 %v3607_v15, %v466_v21  ;;  %v475_v40 = vshll.u32 %v3605_v27, %v466_v21 }
  0x58   :  { %v408_v3 = vsel %vm406_vm6, %v407_v23, %v2497_v19  ;;  %v559_v42 = vshrl.u32 %v558_v54, 23  ;;  %vm484_vm7 = vcmp.lt.s32.totalorder %v2514_v35, 1  ;;  %v478_v48 = vshll.u32 %v3602_v30, %v466_v21 }
  0x59   :  { %v409_v44 = vadd.s32 %v408_v3, %v404_v22  ;;  %v470_v8 = vshrl.u32 %v3607_v15, %v467_v33  ;;  %v473_v45 = vshrl.u32 %v3605_v27, %v467_v33  ;;  %v476_v47 = vshrl.u32 %v3602_v30, %v467_v33 }
  0x5a   :  { %v479_v49 = vshrl.u32 %v3600_v38, %v467_v33  ;;  %v481_v50 = vshll.u32 %v3600_v38, %v466_v21  ;;  %v482_v53 = vshrl.u32 %v3598_v41, %v467_v33  ;;  %vm486_vm8 = vcmp.lt.s32.totalorder %v2514_v35, 3 }
  0x5b   :  { %v410_v51 = vadd.s32 536870912, %v409_v44  ;;  %v471_v52 = vor.u32 %v470_v8, %v469_v39  ;;  %v474_v43 = vor.u32 %v473_v45, %v472_v4  ;;  %v477_v55 = vor.u32 %v476_v47, %v475_v40 }
  0x5c   :  { %v480_v57 = vor.u32 %v479_v49, %v478_v48  ;;  %v2182_v61 = vadd.s32 4294967169, %v559_v42  ;;  %v248_v62 = vcvt.s32.f32 %v240_v24  ;;  %v483_v63 = vor.u32 %v482_v53, %v481_v50 }
  0x5d   :  { %vm485_vm9 = vcmp.lt.s32.totalorder %v2514_v35, 2  ;;  %vm487_vm10 = vcmp.lt.s32.totalorder %v2514_v35, 4  ;;  %v249_v0 = vcvt.s32.f32 %v241_v34  ;;  %v492_v6 = vsel %vm484_vm7, %v471_v52, %v474_v43 }
  0x5e   :  { %v493_v9 = vsel %vm487_vm10, %v480_v57, 920167782  ;;  %v2539_v12 = vshll.u32 %v460_v37, 8  ;;  %v250_v16 = vcvt.s32.f32 %v242_v58  ;;  %v2541_v17 = vshrl.u32 %v410_v51, 30 }
  0x5f   :  { %v494_v19 = vsel %vm486_vm8, %v477_v55, %v493_v9  ;;  %v496_v26 = vsel %vm484_vm7, %v474_v43, %v477_v55  ;;  %v254_v20 = vmul.f32 5.9604645e-08, %v246_v36  ;;  %v497_v54 = vsel %vm487_vm10, %v483_v63, 1326507024 }
  0x60   :  { %v495_v21 = vsel %vm485_vm9, %v492_v6, %v494_v19  ;;  %v565_v24 = vadd.s32 1, %v2182_v61  ;;  %v255_v34 = vmul.f32 5.9604645e-08, %v247_v7  ;;  %2279 = vlog2.f32 %v2487_v10 }
  0x61   :  { %v468_v22 = vshrl.u32 %v3612_v13, %v467_v33  ;;  %v498_v58 = vsel %vm486_vm8, %v480_v57, %v497_v54  ;;  %v489_v23 = vsel %vm487_vm10, %v477_v55, 2102212464  ;;  %2281 = vlog2.f32 %v2489_v11 }
  0x62   :  { %v499_v36 = vsel %vm485_vm9, %v496_v26, %v498_v58  ;;  %v2560_v37 = vmul.u32.u64.low %v2539_v12, %v495_v21  ;;  %v2561_v39 = vmul.u32.u64.high %v2539_v12, %v495_v21, %v2560_v37  ;;  %v412_v10 = vshll.u32 %v2541_v17, 30 }
  0x63   :  { %v2567_v7 = vmul.u32.u64.low %v2539_v12, %v499_v36  ;;  %v2568_v33 = vmul.u32.u64.high %v2539_v12, %v499_v36, %v2567_v7  ;;  %v233_v3 = vmul.f32 5.9604645e-08, %v2473_v56  ;;  %v256_v4 = vmul.f32 5.9604645e-08, %v248_v62 }
  0x64   :  { %v2571_v40 = vmul.f32 6.2831855, %v254_v20  ;;  %vm566_vm11 = vcmp.gt.s32.totalorder %v565_v24, 0  ;;  %2283 = vlog2.f32 %v2500_v25  ;;  %v488_v42 = vsel %vm484_vm7, %v468_v22, %v471_v52 }
  0x65   :  { %v490_v11 = vsel %vm486_vm8, %v474_v43, %v489_v23  ;;  %v3595_v8 = vand.u32 2147483647, %v2483_v5  ;;  %v234_v45 = vmul.f32 5.9604645e-08, %v2481_v2  ;;  %v257_v47 = vmul.f32 5.9604645e-08, %v249_v0 }
  0x66   :  { %v258_v48 = vmul.f32 5.9604645e-08, %v250_v16  ;;  %v567_v49 = vsel %vm566_vm11, %v565_v24, 0  ;;  %2285 = vlog2.f32 %v2505_v28  ;;  %v2581_v56 = vmul.f32 6.2831855, %v255_v34 }
  0x67   :  { %v2583_v50 = vsub.s32 %v409_v44, %v412_v10  ;;  %v510_v25 = vadd.s32 1, %v2561_v39  ;;  %2287 = vlog2.f32 %v2507_v31  ;;  %v491_v51 = vsel %vm485_vm9, %v488_v42, %v490_v11 }
  0x68   :  { %vm509_vm12 = vc.u32 %v2568_v33, %v2560_v37  ;;  %v569_v2 = vand.u32 31, %v567_v49  ;;  %2289 = vlog2.f32 %v2509_v32  ;;  %v2592_v52 = vmul.f32 6.2831855, %v256_v4 }
  0x69   :  { %v562_v28 = vand.u32 8388607, %v3595_v8  ;;  %v661_v44 = vand.u32 2139095040, %v2571_v40  ;;  %2291 = vlog2.f32 %v233_v3  ;;  %v2597_v43 = vmul.f32 6.2831855, %v257_v47 }
  0x6a   :  { %v2599_v31 = vmul.f32 6.2831855, %v258_v48  ;;  %v570_v35 = vsub.s32 32, %v569_v2  ;;  %v415_v53 = vsub.s32 0, %v2583_v50  ;;  %v507_v55 = vmul.u32 %v2539_v12, %v491_v51 }
  0x6b   :  { %v511_v57 = vsel %vm509_vm12, %v510_v25, %v2561_v39  ;;  %v572_v32 = vshll.u32 %v3612_v13, %v569_v2  ;;  %v575_v62 = vshll.u32 %v3607_v15, %v569_v2  ;;  %v581_v0 = vshll.u32 %v3602_v30, %v569_v2 }
  0x6c   :  { %v573_v61 = vshrl.u32 %v3607_v15, %v570_v35  ;;  %v576_v63 = vshrl.u32 %v3605_v27, %v570_v35  ;;  %2293 = vlog2.f32 %v234_v45  ;;  %v563_v6 = vor.u32 8388608, %v562_v28 }
  0x6d   :  { %v568_v9 = vshrl.u32 %v567_v49, 5  ;;  %v662_v16 = vshrl.u32 %v661_v44, 23  ;;  %v2280_v19 = vpop.eup %2279  ;;  %v578_v26 = vshll.u32 %v3605_v27, %v569_v2  ;;  %v579_v12 = vshrl.u32 %v3602_v30, %v570_v35 }
  0x6e   :  { %v582_v20 = vshrl.u32 %v3600_v38, %v570_v35  ;;  %v584_v21 = vshll.u32 %v3600_v38, %v569_v2  ;;  %v2175_v54 = vmin.u32 %v415_v53, %v2583_v50  ;;  %v2614_v24 = vadd.s32 %v511_v57, %v507_v55  ;;  %v2282_v58 = vpop.eup %2281 }
  0x6f   :  { %v3596_v34 = vand.u32 2147483647, %v2571_v40  ;;  %v3604_v22 = vand.u32 2147483647, %v2581_v56  ;;  %v574_v23 = vor.u32 %v573_v61, %v572_v32  ;;  %v577_v36 = vor.u32 %v576_v63, %v575_v62 }
  0x70   :  { %v583_v39 = vor.u32 %v582_v20, %v581_v0  ;;  %v585_v10 = vshrl.u32 %v3598_v41, %v570_v35  ;;  %v260_v7 = vmul.f32 0.6931472, %v2280_v19  ;;  %v571_v3 = vshrl.u32 %v3612_v13, %v570_v35 }
  0x71   :  { %vm587_vm13 = vcmp.lt.s32.totalorder %v568_v9, 1  ;;  %v2186_v4 = vadd.s32 4294967169, %v662_v16  ;;  %v2284_v42 = vpop.eup %2283  ;;  %v580_v11 = vor.u32 %v579_v12, %v578_v26  ;;  %vm590_vm14 = vcmp.lt.s32.totalorder %v568_v9, 4 }
  0x72   :  { %v586_v45 = vor.u32 %v585_v10, %v584_v21  ;;  %v603_v47 = vshll.u32 %v563_v6, 8  ;;  %v262_v48 = vmul.f32 0.6931472, %v2282_v58  ;;  %v417_v49 = vclz %v2175_v54 }
  0x73   :  { %vm588_vm15 = vcmp.lt.s32.totalorder %v568_v9, 2  ;;  %vm589_vm0 = vcmp.lt.s32.totalorder %v568_v9, 3  ;;  %v2286_v25 = vpop.eup %2285  ;;  %v513_v51 = vadd.s32 536870912, %v2614_v24  ;;  %v592_v2 = vsel %vm590_vm14, %v580_v11, 2102212464 }
  0x74   :  { %v595_v28 = vsel %vm587_vm13, %v574_v23, %v577_v36  ;;  %v596_v44 = vsel %vm590_vm14, %v583_v39, 920167782  ;;  %v2288_v35 = vpop.eup %2287  ;;  %v264_v53 = vmul.f32 0.6931472, %v2284_v42  ;;  %v2624_v55 = vmul.f32 -2.0, %v260_v7 }
  0x75   :  { %v591_v57 = vsel %vm587_vm13, %v571_v3, %v574_v23  ;;  %v668_v32 = vadd.s32 1, %v2186_v4  ;;  %v2290_v61 = vpop.eup %2289  ;;  %v593_v62 = vsel %vm589_vm0, %v577_v36, %v592_v2  ;;  %v597_v63 = vsel %vm589_vm0, %v580_v11, %v596_v44 }
  0x76   :  { %v599_v0 = vsel %vm587_vm13, %v577_v36, %v580_v11  ;;  %v600_v6 = vsel %vm590_vm14, %v586_v45, 1326507024  ;;  %v2292_v16 = vpop.eup %2291  ;;  %v266_v19 = vmul.f32 0.6931472, %v2286_v25  ;;  %v2631_v26 = vmul.f32 -2.0, %v262_v48 }
  0x77   :  { %v2176_v12 = vadd.s32 4294967294, %v417_v49  ;;  %v598_v20 = vsel %vm588_vm15, %v595_v28, %v597_v63  ;;  %v2634_v21 = vshrl.u32 %v513_v51, 30  ;;  %v601_v54 = vsel %vm589_vm0, %v583_v39, %v600_v6 }
  0x78   :  { %v2637_v58 = vmul.u32.u64.low %v603_v47, %v598_v20  ;;  %v2638_v23 = vmul.u32.u64.high %v603_v47, %v598_v20, %v2637_v58  ;;  %v268_v10 = vmul.f32 0.6931472, %v2288_v35  ;;  %v594_v36 = vsel %vm588_vm15, %v591_v57, %v593_v62 }
  0x79   :  { %v602_v7 = vsel %vm588_vm15, %v599_v0, %v601_v54  ;;  %vm669_vm1 = vcmp.gt.s32.totalorder %v668_v32, 0  ;;  %v2294_v3 = vpop.eup %2293  ;;  %v270_v4 = vmul.f32 0.6931472, %v2290_v61  ;;  %v2646_v48 = vmul.f32 -2.0, %v264_v53 }
  0x7a   :  { %v2643_v42 = vmul.u32.u64.low %v603_v47, %v602_v7  ;;  %v2644_v11 = vmul.u32.u64.high %v603_v47, %v602_v7, %v2643_v42  ;;  %v670_v45 = vsel %vm669_vm1, %v668_v32, 0  ;;  %v2648_v49 = vmul.f32 -2.0, %v266_v19 }
  0x7b   :  { %2295 = vrsqrt.f32 %v2624_v55  ;;  %v672_v39 = vand.u32 31, %v670_v45  ;;  %vm2177_vm2 = vcmp.lt.s32.totalorder %v2176_v12, 0  ;;  %v515_v25 = vshll.u32 %v2634_v21, 30 }
  0x7c   :  { %v610_v51 = vmul.u32 %v603_v47, %v594_v36  ;;  %v613_v9 = vadd.s32 1, %v2638_v23  ;;  %v272_v2 = vmul.f32 0.6931472, %v2292_v16  ;;  %v2653_v28 = vmul.f32 -2.0, %v268_v10 }
  0x7d   :  { %v288_v44 = vand.u32 2147483648, %v2624_v55  ;;  %2297 = vrsqrt.f32 %v2631_v26  ;;  %v274_v35 = vmul.f32 0.6931472, %v2294_v3  ;;  %v2657_v53 = vmul.f32 -2.0, %v270_v4 }
  0x7e   :  { %vm612_vm3 = vc.u32 %v2644_v11, %v2637_v58  ;;  %v673_v57 = vsub.s32 32, %v672_v39  ;;  %v295_v32 = vand.u32 2147483648, %v2631_v26  ;;  %2299 = vrsqrt.f32 %v2646_v48 }
  0x7f   :  { %v2663_v47 = vsel %vm2177_vm2, 0, %v2176_v12  ;;  %v614_v61 = vsel %vm612_vm3, %v613_v9, %v2638_v23  ;;  %2301 = vrsqrt.f32 %v2648_v49  ;;  %v2668_v62 = vsub.s32 %v2614_v24, %v515_v25 }
  0x80   :  { %v2670_v63 = vadd.s32 %v614_v61, %v610_v51  ;;  %v675_v0 = vshll.u32 %v3612_v13, %v672_v39  ;;  %v676_v6 = vshrl.u32 %v3607_v15, %v673_v57  ;;  %v678_v16 = vshll.u32 %v3607_v15, %v672_v39 }
  0x81   :  { %v679_v19 = vshrl.u32 %v3605_v27, %v673_v57  ;;  %v681_v12 = vshll.u32 %v3605_v27, %v672_v39  ;;  %v425_v20 = vsub.s32 4294967266, %v2663_v47  ;;  %v2678_v54 = vshrl.u32 %v670_v45, 5 }
  0x82   :  { %v682_v23 = vshrl.u32 %v3602_v30, %v673_v57  ;;  %v684_v24 = vshll.u32 %v3602_v30, %v672_v39  ;;  %2303 = vrsqrt.f32 %v2653_v28  ;;  %v405_v10 = vadd.s32 %v2496_v18, %v2492_v14 }
  0x83   :  { %v665_v36 = vand.u32 8388607, %v3596_v34  ;;  %v685_v7 = vshrl.u32 %v3600_v38, %v673_v57  ;;  %v518_v3 = vsub.s32 0, %v2668_v62  ;;  %v616_v4 = vadd.s32 536870912, %v2670_v63 }
  0x84   :  { %v687_v42 = vshll.u32 %v3600_v38, %v672_v39  ;;  %v688_v45 = vshrl.u32 %v3598_v41, %v673_v57  ;;  %v677_v25 = vor.u32 %v676_v6, %v675_v0  ;;  %v680_v51 = vor.u32 %v679_v19, %v678_v16 }
  0x85   :  { %v683_v9 = vor.u32 %v682_v23, %v681_v12  ;;  %v686_v61 = vor.u32 %v685_v7, %v684_v24  ;;  %v421_v8 = vsub.s32 32, %v2663_v47  ;;  %v426_v14 = vadd.s32 127, %v425_v20 }
  0x86   :  { %vm690_vm4 = vcmp.lt.s32.totalorder %v2678_v54, 1  ;;  %vm692_vm5 = vcmp.lt.s32.totalorder %v2678_v54, 3  ;;  %v2695_v18 = vmul.f32 -2.0, %v272_v2  ;;  %v666_v34 = vor.u32 8388608, %v665_v36 }
  0x87   :  { %v689_v60 = vor.u32 %v688_v45, %v687_v42  ;;  %vm693_vm6 = vcmp.lt.s32.totalorder %v2678_v54, 4  ;;  %2305 = vrsqrt.f32 %v2657_v53  ;;  %v2179_v0 = vmin.u32 %v518_v3, %v2668_v62 }
  0x88   :  { %v2296_v39 = vpop.eup %2295  ;;  %v2700_v6 = vshrl.u32 %v616_v4, 30  ;;  %v699_v16 = vsel %vm693_vm6, %v686_v61, 920167782  ;;  %vm285_vm7 = vcmp.eq.f32.partialorder %v2624_v55, inf  ;;  %vm292_vm8 = vcmp.eq.f32.partialorder %v2631_v26, inf }
  0x89   :  { %v674_v2 = vshrl.u32 %v3612_v13, %v673_v57  ;;  %vm691_vm9 = vcmp.lt.s32.totalorder %v2678_v54, 2  ;;  %v698_v19 = vsel %vm690_vm4, %v677_v25, %v680_v51  ;;  %v700_v12 = vsel %vm692_vm5, %v683_v9, %v699_v16 }
  0x8a   :  { %v2298_v20 = vpop.eup %2297  ;;  %v422_v23 = vshll.u32 %v2583_v50, %v2663_v47  ;;  %v423_v24 = vshrl.u32 %v405_v10, %v421_v8  ;;  %v427_v36 = vshll.u32 %v426_v14, 23  ;;  %v695_v7 = vsel %vm693_vm6, %v683_v9, 2102212464 }
  0x8b   :  { %v2716_v3 = vmul.f32 -2.0, %v274_v35  ;;  %v302_v57 = vand.u32 2147483648, %v2646_v48  ;;  %v703_v4 = vsel %vm693_vm6, %v689_v60, 1326507024  ;;  %v706_v42 = vshll.u32 %v666_v34, 8  ;;  %v2300_v45 = vpop.eup %2299 }
  0x8c   :  { %vm287_vm10 = vcmp.eq.f32.partialorder %v2624_v55, 0.0  ;;  %2307 = vrsqrt.f32 %v2695_v18  ;;  %v618_v50 = vshll.u32 %v2700_v6, 30  ;;  %v701_v8 = vsel %vm691_vm9, %v698_v19, %v700_v12  ;;  %v2302_v47 = vpop.eup %2301 }
  0x8d   :  { %v702_v35 = vsel %vm690_vm4, %v680_v51, %v683_v9  ;;  %vm294_vm11 = vcmp.eq.f32.partialorder %v2631_v26, 0.0  ;;  %vm299_vm12 = vcmp.eq.f32.partialorder %v2646_v48, inf  ;;  %v309_v60 = vand.u32 2147483648, %v2648_v49 }
  0x8e   :  { %v520_v34 = vclz %v2179_v0  ;;  %v694_v10 = vsel %vm690_vm4, %v674_v2, %v677_v25  ;;  %v696_v14 = vsel %vm692_vm5, %v680_v51, %v695_v7  ;;  %v284_v16 = vmul.f32 %v2296_v39, %v2624_v55 }
  0x8f   :  { %vm306_vm13 = vcmp.eq.f32.partialorder %v2648_v49, inf  ;;  %v424_v19 = vor.u32 %v423_v24, %v422_v23  ;;  %v428_v9 = vor.u32 4788187, %v427_v36  ;;  %v704_v12 = vsel %vm692_vm5, %v686_v61, %v703_v4  ;;  %v2304_v25 = vpop.eup %2303 }
  0x90   :  { %v291_v41 = vmul.f32 %v2298_v20, %v2631_v26  ;;  %v705_v0 = vsel %vm691_vm9, %v702_v35, %v704_v12  ;;  %v2742_v38 = vmul.u32.u64.low %v706_v42, %v701_v8  ;;  %v2743_v30 = vmul.u32.u64.high %v706_v42, %v701_v8, %v2742_v38 }
  0x91   :  { %v2747_v51 = vsub.s32 %v2670_v63, %v618_v50  ;;  %v697_v39 = vsel %vm691_vm9, %v694_v10, %v696_v14  ;;  %v2751_v2 = vmul.u32.u64.low %v706_v42, %v705_v0  ;;  %v2752_v23 = vmul.u32.u64.high %v706_v42, %v705_v0, %v2751_v2 }
  0x92   :  { %vm301_vm14 = vcmp.eq.f32.partialorder %v2646_v48, 0.0  ;;  %vm308_vm15 = vcmp.eq.f32.partialorder %v2648_v49, 0.0  ;;  %vm313_vm0 = vcmp.eq.f32.partialorder %v2653_v28, inf  ;;  %v316_v61 = vand.u32 2147483648, %v2653_v28 }
  0x93   :  { %v2180_v20 = vadd.s32 4294967294, %v520_v34  ;;  %v764_v24 = vand.u32 2139095040, %v2581_v56  ;;  %vm315_vm1 = vcmp.eq.f32.partialorder %v2653_v28, 0.0  ;;  %vm320_vm2 = vcmp.eq.f32.partialorder %v2657_v53, inf }
  0x94   :  { %v429_v36 = vand.u32 2147483647, %v428_v9  ;;  %v431_v7 = vcvt.s32.f32 %v424_v19  ;;  %2309 = vrsqrt.f32 %v2716_v3  ;;  %vm351_vm3 = vcmp.lt.s32.totalorder %v2441_v46, 0  ;;  %v2306_v19 = vpop.eup %2305 }
  0x95   :  { %v713_v4 = vmul.u32 %v706_v42, %v697_v39  ;;  %v716_v50 = vadd.s32 1, %v2743_v30  ;;  %v765_v8 = vshrl.u32 %v764_v24, 23  ;;  %v286_v35 = vsel %vm285_vm7, %v2624_v55, %v284_v16 }
  0x96   :  { %v293_v34 = vsel %vm292_vm8, %v2631_v26, %v291_v41  ;;  %v298_v10 = vmul.f32 %v2300_v45, %v2646_v48  ;;  %v621_v14 = vsub.s32 0, %v2747_v51  ;;  %v305_v9 = vmul.f32 %v2302_v47, %v2648_v49 }
  0x97   :  { %vm2181_vm4 = vcmp.lt.s32.totalorder %v2180_v20, 0  ;;  %vm715_vm5 = vc.u32 %v2752_v23, %v2742_v38  ;;  %v2190_v42 = vadd.s32 4294967169, %v765_v8  ;;  %v312_v12 = vmul.f32 %v2304_v25, %v2653_v28 }
  0x98   :  { %vm2781_vm6 = vcmp.le.f32.partialorder %v349_v59, 0.7853982  ;;  %v432_v45 = vmul.f32 %v431_v7, %v429_v36  ;;  %v717_v0 = vsel %vm715_vm5, %v716_v50, %v2743_v30  ;;  %v2790_v47 = vsel %vm287_vm10, %v288_v44, %v286_v35 }
  0x99   :  { %v718_v39 = vadd.s32 %v717_v0, %v713_v4  ;;  %v771_v2 = vadd.s32 1, %v2190_v42  ;;  %v867_v25 = vand.u32 2139095040, %v2592_v52  ;;  %v2797_v59 = vsel %vm294_vm11, %v295_v32, %v293_v34  ;;  %v2308_v44 = vpop.eup %2307 }
  0x9a   :  { %3632 = vst [vmem:[#allocation11_spill] sm:$0xff] %v2797_v59  ;;  %v300_v30 = vsel %vm299_vm12, %v2646_v48, %v298_v10  ;;  %v2802_v24 = vsel %vm2181_vm4, 0, %v2180_v20  ;;  %v2183_v55 = vmin.u32 %v621_v14, %v2747_v51  ;;  %v307_v36 = vsel %vm306_vm13, %v2648_v49, %v305_v9 }
  0x9b   :  { %v319_v7 = vmul.f32 %v2306_v19, %v2657_v53  ;;  %v719_v4 = vadd.s32 536870912, %v718_v39  ;;  %vm772_vm7 = vcmp.gt.s32.totalorder %v771_v2, 0  ;;  %v314_v26 = vsel %vm313_vm0, %v2653_v28, %v312_v12 }
  0x9c   :  { %v433_v32 = vxor.u32 2147483648, %v432_v45  ;;  %v435_v50 = vsub.s32 4, %v2541_v17  ;;  %v773_v20 = vsel %vm772_vm7, %v771_v2, 0  ;;  %v528_v8 = vsub.s32 4294967266, %v2802_v24 }
  0x9d   :  { %v2814_v35 = vshrl.u32 %v719_v4, 30  ;;  %v775_v34 = vand.u32 31, %v773_v20  ;;  %v868_v10 = vshrl.u32 %v867_v25, 23  ;;  %v2820_v14 = vsel %vm301_vm14, %v302_v57, %v300_v30 }
  0x9e   :  { %3633 = vst [vmem:[#allocation12_spill] sm:$0xff] %v2820_v14  ;;  %v2826_v19 = vsel %vm308_vm15, %v309_v60, %v307_v36  ;;  %v2829_v9 = vmul.f32 %v2308_v44, %v2695_v18  ;;  %v623_v42 = vclz %v2183_v55  ;;  %v2833_v12 = vsel %vm315_vm1, %v316_v61, %v314_v26 }
  0x9f   :  { %3634 = vst [vmem:[#allocation13_spill] sm:$0xff] %v2826_v19  ;;  %3635 = vst [vmem:[#allocation14_spill] sm:$0xff] %v2833_v12  ;;  %v2838_v48 = vsel %vm320_vm2, %v2657_v53, %v319_v7  ;;  %v721_v57 = vshll.u32 %v2814_v35, 30  ;;  %v776_v0 = vsub.s32 32, %v775_v34  ;;  %v434_v49 = vsel %vm351_vm3, %v433_v32, %v432_v45 }
  0xa0   :  { %3636 = vst [vmem:[#allocation15_spill] sm:$0xff] %v2838_v48  ;;  %v436_v60 = vsel %vm351_vm3, %v435_v50, %v2541_v17  ;;  %v508_v28 = vadd.s32 %v2560_v37, %v2568_v33  ;;  %v768_v61 = vand.u32 8388607, %v3604_v22  ;;  %v524_v2 = vsub.s32 32, %v2802_v24 }
  0xa1   :  { %v529_v25 = vadd.s32 127, %v528_v8  ;;  %v2851_v30 = vsub.s32 %v718_v39, %v721_v57  ;;  %v2194_v55 = vadd.s32 4294967169, %v868_v10  ;;  %v2310_v44 = vpop.eup %2309  ;;  %v2184_v36 = vadd.s32 4294967294, %v623_v42 }
  0xa2   :  { %v778_v45 = vshll.u32 %v3612_v13, %v775_v34  ;;  %v779_v7 = vshrl.u32 %v3607_v15, %v776_v0  ;;  %v781_v17 = vshll.u32 %v3607_v15, %v775_v34  ;;  %v437_v37 = vsel %vm2781_vm6, %v2441_v46, %v434_v49 }
  0xa3   :  { %v2861_v33 = vsel %vm2781_vm6, 0, %v436_v60  ;;  %v724_v39 = vsub.s32 0, %v2851_v30  ;;  %v782_v4 = vshrl.u32 %v3605_v27, %v776_v0  ;;  %v769_v26 = vor.u32 8388608, %v768_v61 }
  0xa4   :  { %3637 = vst [vmem:[#allocation16_spill] sm:$0xff] %v2861_v33  ;;  %v774_v32 = vshrl.u32 %v773_v20, 5  ;;  %v784_v50 = vshll.u32 %v3605_v27, %v775_v34  ;;  %v3638_v8 = vmov 2102212464   ;;  %v525_v42 = vshll.u32 %v2668_v62, %v2802_v24 }
  0xa5   :  { %v785_v10 = vshrl.u32 %v3638_v8, %v776_v0  ;;  %v526_v57 = vshrl.u32 %v508_v28, %v524_v2  ;;  %v787_v49 = vshll.u32 %v3638_v8, %v775_v34  ;;  %v874_v16 = vadd.s32 1, %v2194_v55 }
  0xa6   :  { %v530_v41 = vshll.u32 %v529_v25, 23  ;;  %vm2185_vm8 = vcmp.lt.s32.totalorder %v2184_v36, 0  ;;  %v780_v60 = vor.u32 %v779_v7, %v778_v45  ;;  %v783_v54 = vor.u32 %v782_v4, %v781_v17 }
  0xa7   :  { %v2187_v63 = vmin.u32 %v724_v39, %v2851_v30  ;;  %v777_v61 = vshrl.u32 %v3612_v13, %v776_v0  ;;  %v3639_v20 = vmov 920167782   ;;  %v786_v15 = vor.u32 %v785_v10, %v784_v50 }
  0xa8   :  { %v788_v22 = vshrl.u32 %v3639_v20, %v776_v0  ;;  %v790_v27 = vshll.u32 %v3639_v20, %v775_v34  ;;  %v3640_v1 = vmov 1326507024   ;;  %vm793_vm9 = vcmp.lt.s32.totalorder %v774_v32, 1 }
  0xa9   :  { %v791_v12 = vshrl.u32 %v3640_v1, %v776_v0  ;;  %v809_v62 = vshll.u32 %v769_v26, 8  ;;  %vm795_vm10 = vcmp.lt.s32.totalorder %v774_v32, 3  ;;  %vm796_vm11 = vcmp.lt.s32.totalorder %v774_v32, 4 }
  0xaa   :  { %v789_v24 = vor.u32 %v788_v22, %v787_v49  ;;  %vm875_vm12 = vcmp.gt.s32.totalorder %v874_v16, 0  ;;  %vm794_vm13 = vcmp.lt.s32.totalorder %v774_v32, 2  ;;  %v798_v2 = vsel %vm796_vm11, %v786_v15, 2102212464 }
  0xab   :  { %v792_v28 = vor.u32 %v791_v12, %v790_v27  ;;  %v801_v25 = vsel %vm793_vm9, %v780_v60, %v783_v54  ;;  %v2877_v55 = vsel %vm2185_vm8, 0, %v2184_v36  ;;  %v726_v45 = vclz %v2187_v63 }
  0xac   :  { %v797_v34 = vsel %vm793_vm9, %v777_v61, %v780_v60  ;;  %v802_v7 = vsel %vm796_vm11, %v789_v24, 920167782  ;;  %v799_v0 = vsel %vm795_vm10, %v783_v54, %v798_v2  ;;  %v805_v22 = vsel %vm793_vm9, %v783_v54, %v786_v15 }
  0xad   :  { %v803_v17 = vsel %vm795_vm10, %v786_v15, %v802_v7  ;;  %v806_v39 = vsel %vm796_vm11, %v792_v28, 1326507024  ;;  %2311 = vcosq.f32 %v437_v37  ;;  %v2883_v27 = vor.u32 %v526_v57, %v525_v42 }
  0xae   :  { %v804_v12 = vsel %vm794_vm13, %v801_v25, %v803_v17  ;;  %v876_v4 = vsel %vm875_vm12, %v874_v16, 0  ;;  %v2887_v36 = vor.u32 4788187, %v530_v41  ;;  %v807_v63 = vsel %vm795_vm10, %v789_v24, %v806_v39 }
  0xaf   :  { %v2890_v26 = vmul.u32.u64.low %v809_v62, %v804_v12  ;;  %v2891_v50 = vmul.u32.u64.high %v809_v62, %v804_v12, %v2890_v26  ;;  %v631_v10 = vsub.s32 4294967266, %v2877_v55  ;;  %v800_v15 = vsel %vm794_vm13, %v797_v34, %v799_v0 }
  0xb0   :  { %v808_v54 = vsel %vm794_vm13, %v805_v22, %v807_v63  ;;  %v3611_v42 = vand.u32 2147483647, %v2592_v52  ;;  %v2188_v57 = vadd.s32 4294967294, %v726_v45  ;;  %v878_v16 = vand.u32 31, %v876_v4 }
  0xb1   :  { %v2898_v49 = vmul.u32.u64.low %v809_v62, %v808_v54  ;;  %v2899_v60 = vmul.u32.u64.high %v809_v62, %v808_v54, %v2898_v49  ;;  %v2902_v41 = vmul.f32 %v2310_v44, %v2716_v3  ;;  %2313 = vsinq.f32 %v437_v37 }
  0xb2   :  { %v2905_v61 = vand.u32 3, %v2861_v33  ;;  %v611_v24 = vadd.s32 %v2637_v58, %v2644_v11  ;;  %v816_v28 = vmul.u32 %v809_v62, %v800_v15  ;;  %v819_v2 = vadd.s32 1, %v2891_v50 }
  0xb3   :  { %v879_v25 = vsub.s32 32, %v878_v16  ;;  %v627_v34 = vsub.s32 32, %v2877_v55  ;;  %v632_v7 = vadd.s32 127, %v631_v10  ;;  %v871_v44 = vand.u32 8388607, %v3611_v42 }
  0xb4   :  { %vm2189_vm14 = vcmp.lt.s32.totalorder %v2188_v57, 0  ;;  %vm818_vm15 = vc.u32 %v2899_v60, %v2890_v26  ;;  %v2917_v37 = vshrl.u32 %v876_v4, 5  ;;  %v881_v58 = vshll.u32 %v3612_v13, %v878_v16 }
  0xb5   :  { %v820_v11 = vsel %vm818_vm15, %v819_v2, %v2891_v50  ;;  %v3641_v62 = vmov 2475754826   ;;  %v890_v22 = vshll.u32 %v3638_v8, %v878_v16  ;;  %v3642_v12 = vmov 2131351028  }
  0xb6   :  { %v882_v0 = vshrl.u32 %v3641_v62, %v879_v25  ;;  %v884_v17 = vshll.u32 %v3641_v62, %v878_v16  ;;  %v821_v39 = vadd.s32 %v820_v11, %v816_v28  ;;  %v885_v63 = vshrl.u32 %v3642_v12, %v879_v25 }
  0xb7   :  { %v887_v10 = vshll.u32 %v3642_v12, %v878_v16  ;;  %v888_v15 = vshrl.u32 %v3638_v8, %v879_v25  ;;  %v628_v4 = vshll.u32 %v2747_v51, %v2877_v55  ;;  %v629_v54 = vshrl.u32 %v611_v24, %v627_v34 }
  0xb8   :  { %v633_v49 = vshll.u32 %v632_v7, 23  ;;  %v891_v50 = vshrl.u32 %v3639_v20, %v879_v25  ;;  %v2931_v2 = vsel %vm2189_vm14, 0, %v2188_v57  ;;  %v822_v42 = vadd.s32 536870912, %v821_v39 }
  0xb9   :  { %v872_v32 = vor.u32 8388608, %v871_v44  ;;  %vm896_vm0 = vcmp.lt.s32.totalorder %v2917_v37, 1  ;;  %v883_v28 = vor.u32 %v882_v0, %v881_v58  ;;  %v886_v11 = vor.u32 %v885_v63, %v884_v17 }
  0xba   :  { %v892_v45 = vor.u32 %v891_v50, %v890_v22  ;;  %v893_v13 = vshll.u32 %v3639_v20, %v878_v16  ;;  %v2935_v19 = vpop.eup %2311  ;;  %v2937_v48 = vshrl.u32 %v822_v42, 30  ;;  %v889_v51 = vor.u32 %v888_v15, %v887_v10 }
  0xbb   :  { %v894_v55 = vshrl.u32 %v3640_v1, %v879_v25  ;;  %vm899_vm1 = vcmp.lt.s32.totalorder %v2917_v37, 4  ;;  %vm327_vm2 = vcmp.eq.f32.partialorder %v2695_v18, inf  ;;  %v630_v57 = vor.u32 %v629_v54, %v628_v4 }
  0xbc   :  { %v714_v24 = vadd.s32 %v2742_v38, %v2752_v23  ;;  %v734_v34 = vsub.s32 4294967266, %v2931_v2  ;;  %v3643_v7 = vmov 683565275   ;;  %v824_v16 = vshll.u32 %v2937_v48, 30 }
  0xbd   :  { %v880_v44 = vshrl.u32 %v3643_v7, %v879_v25  ;;  %v895_v58 = vor.u32 %v894_v55, %v893_v13  ;;  %vm898_vm3 = vcmp.lt.s32.totalorder %v2917_v37, 3  ;;  %v901_v42 = vsel %vm899_vm1, %v889_v51, 2102212464 }
  0xbe   :  { %vm897_vm4 = vcmp.lt.s32.totalorder %v2917_v37, 2  ;;  %v904_v0 = vsel %vm896_vm0, %v883_v28, %v886_v11  ;;  %v905_v38 = vsel %vm899_vm1, %v892_v45, 920167782  ;;  %v912_v23 = vshll.u32 %v872_v32, 8  ;;  %v2955_v17 = vpop.eup %2313 }
  0xbf   :  { %v634_v25 = vor.u32 4788187, %v633_v49  ;;  %v730_v22 = vsub.s32 32, %v2931_v2  ;;  %v2958_v13 = vsub.s32 %v821_v39, %v824_v16  ;;  %v908_v63 = vsel %vm896_vm0, %v886_v11, %v889_v51 }
  0xc0   :  { %v900_v10 = vsel %vm896_vm0, %v880_v44, %v883_v28  ;;  %v902_v15 = vsel %vm898_vm3, %v886_v11, %v901_v42  ;;  %v906_v4 = vsel %vm898_vm3, %v889_v51, %v905_v38  ;;  %v909_v32 = vsel %vm899_vm1, %v895_v58, 1326507024 }
  0xc1   :  { %vm454_vm5 = vcmp.lt.s32.totalorder %v2444_v29, 0  ;;  %v735_v54 = vadd.s32 127, %v734_v34  ;;  %v827_v39 = vsub.s32 0, %v2958_v13  ;;  %v907_v49 = vsel %vm897_vm4, %v904_v0, %v906_v4 }
  0xc2   :  { %v910_v50 = vsel %vm898_vm3, %v892_v45, %v909_v32  ;;  %vm557_vm6 = vcmp.lt.s32.totalorder %v2483_v5, 0  ;;  %v2979_v11 = vmul.u32.u64.low %v912_v23, %v907_v49  ;;  %v2980_v51 = vmul.u32.u64.high %v912_v23, %v907_v49, %v2979_v11 }
  0xc3   :  { %v911_v28 = vsel %vm897_vm4, %v908_v63, %v910_v50  ;;  %v970_v55 = vand.u32 2139095040, %v2597_v43  ;;  %vm334_vm7 = vcmp.eq.f32.partialorder %v2716_v3, inf  ;;  %v3644_v34 = vand.u32 2147483647, %v2887_v36 }
  0xc4   :  { %v3645_v44 = vcvt.s32.f32 %v2883_v27  ;;  %v637_v58 = vcvt.s32.f32 %v630_v57  ;;  %v2191_v45 = vmin.u32 %v827_v39, %v2958_v13  ;;  %v903_v42 = vsel %vm897_vm4, %v900_v10, %v902_v15 }
  0xc5   :  { %v3646_v0 = vand.u32 2147483647, %v2444_v29  ;;  %v635_v63 = vand.u32 2147483647, %v634_v25  ;;  %v2998_v4 = vmul.u32.u64.low %v912_v23, %v911_v28  ;;  %v2999_v32 = vmul.u32.u64.high %v912_v23, %v911_v28, %v2998_v4 }
  0xc6   :  { %v535_v16 = vmul.f32 %v3645_v44, %v3644_v34  ;;  %v971_v36 = vshrl.u32 %v970_v55, 23  ;;  %v731_v27 = vshll.u32 %v2851_v30, %v2931_v2  ;;  %v732_v57 = vshrl.u32 %v714_v24, %v730_v22 }
  0xc7   :  { %vm2994_vm8 = vcmp.le.f32.partialorder %v3646_v0, 0.7853982  ;;  %v736_v49 = vshll.u32 %v735_v54, 23  ;;  %v829_v39 = vclz %v2191_v45  ;;  %v538_v37 = vsub.s32 4, %v2634_v21 }
  0xc8   :  { %v3649_v10 = vand.u32 2147483647, %v2483_v5  ;;  %v919_v50 = vmul.u32 %v912_v23, %v903_v42  ;;  %v922_v25 = vadd.s32 1, %v2980_v51  ;;  %v2198_v28 = vadd.s32 4294967169, %v971_v36 }
  0xc9   :  { %v3015_v30 = vsel %vm327_vm2, %v2695_v18, %v2829_v9  ;;  %vm447_vm10 = vcmp.eq.s32.totalorder %v2905_v61, 2  ;;  %v641_v2 = vsub.s32 4, %v2700_v6  ;;  %v2192_v24 = vadd.s32 4294967294, %v829_v39 }
  0xca   :  { %vm3006_vm9 = vcmp.le.f32.partialorder %v3649_v10, 0.7853982  ;;  %3652 = vst [vmem:[#allocation17_spill] sm:$0xff] %v3015_v30  ;;  %v536_v22 = vxor.u32 2147483648, %v535_v16  ;;  %v638_v54 = vmul.f32 %v637_v58, %v635_v63  ;;  %vm921_vm11 = vc.u32 %v2999_v32, %v2979_v11 }
  0xcb   :  { %v977_v23 = vadd.s32 1, %v2198_v28  ;;  %v733_v55 = vor.u32 %v732_v57, %v731_v27  ;;  %v737_v34 = vor.u32 4788187, %v736_v49  ;;  %vm2193_vm12 = vcmp.lt.s32.totalorder %v2192_v24, 0 }
  0xcc   :  { %v923_v44 = vsel %vm921_vm11, %v922_v25, %v2980_v51  ;;  %v539_v9 = vsel %vm454_vm5, %v538_v37, %v2634_v21  ;;  %v3025_v45 = vsel %vm2193_vm12, 0, %v2192_v24  ;;  %v3615_v0 = vxor.u32 2147483648, %v2935_v19 }
  0xcd   :  { %v924_v42 = vadd.s32 %v923_v44, %v919_v50  ;;  %vm978_vm13 = vcmp.gt.s32.totalorder %v977_v23, 0  ;;  %v642_v58 = vsel %vm557_vm6, %v641_v2, %v2700_v6  ;;  %v3616_v63 = vand.u32 2147483647, %v2597_v43 }
  0xce   :  { %v979_v4 = vsel %vm978_vm13, %v977_v23, 0  ;;  %v537_v51 = vsel %vm454_vm5, %v536_v22, %v535_v16  ;;  %v639_v36 = vxor.u32 2147483648, %v638_v54  ;;  %v3036_v21 = vsel %vm2994_vm8, 0, %v539_v9 }
  0xcf   :  { %v925_v27 = vadd.s32 536870912, %v924_v42  ;;  %v981_v57 = vand.u32 31, %v979_v4  ;;  %3653 = vst [vmem:[#allocation18_spill] sm:$0xff] %v3036_v21  ;;  %v738_v49 = vand.u32 2147483647, %v737_v34  ;;  %v740_v39 = vcvt.s32.f32 %v733_v55 }
  0xd0   :  { %v837_v37 = vsub.s32 4294967266, %v3025_v45  ;;  %v3043_v6 = vsel %vm334_vm7, %v2716_v3, %v2902_v41  ;;  %v3046_v10 = vand.u32 3, %v3036_v21  ;;  %v3054_v28 = vsel %vm2994_vm8, %v2444_v29, %v537_v51 }
  0xd1   :  { %3654 = vst [vmem:[#allocation19_spill] sm:$0xff] %v3043_v6  ;;  %v3048_v16 = vshrl.u32 %v925_v27, 30  ;;  %v982_v50 = vsub.s32 32, %v981_v57  ;;  %v3058_v2 = vsel %vm3006_vm9, 0, %v642_v58  ;;  %v974_v41 = vand.u32 8388607, %v3616_v63 }
  0xd2   :  { %v3067_v24 = vsel %vm447_vm10, %v3615_v0, %v2955_v17  ;;  %v3071_v22 = vsel %vm557_vm6, %v639_v36, %v638_v54  ;;  %v817_v38 = vadd.s32 %v2890_v26, %v2899_v60  ;;  %v3076_v55 = vmul.f32 %v740_v39, %v738_v49 }
  0xd3   :  { %v927_v23 = vshll.u32 %v3048_v16, 30  ;;  %v833_v34 = vsub.s32 32, %v3025_v45  ;;  %v838_v44 = vadd.s32 127, %v837_v37  ;;  %v984_v9 = vshll.u32 %v3643_v7, %v981_v57 }
  0xd4   :  { %v985_v51 = vshrl.u32 %v3641_v62, %v982_v50  ;;  %v987_v27 = vshll.u32 %v3641_v62, %v981_v57  ;;  %v988_v54 = vshrl.u32 %v3642_v12, %v982_v50  ;;  %v975_v36 = vor.u32 8388608, %v974_v41 }
  0xd5   :  { %v3080_v58 = vsub.s32 %v924_v42, %v927_v23  ;;  %v980_v0 = vshrl.u32 %v979_v4, 5  ;;  %v990_v26 = vshll.u32 %v3642_v12, %v981_v57  ;;  %v991_v60 = vshrl.u32 %v3638_v8, %v982_v50 }
  0xd6   :  { %v834_v49 = vshll.u32 %v2958_v13, %v3025_v45  ;;  %v993_v42 = vshll.u32 %v3638_v8, %v981_v57  ;;  %v1073_v37 = vand.u32 2139095040, %v2599_v31  ;;  %vm444_vm14 = vcmp.eq.s32.totalorder %v2905_v61, 0 }
  0xd7   :  { %v930_v39 = vsub.s32 0, %v3080_v58  ;;  %v835_v23 = vshrl.u32 %v817_v38, %v833_v34  ;;  %v839_v63 = vshll.u32 %v838_v44, 23  ;;  %v994_v41 = vshrl.u32 %v3639_v20, %v982_v50 }
  0xd8   :  { %v996_v4 = vshll.u32 %v3639_v20, %v981_v57  ;;  %vm660_vm15 = vcmp.lt.s32.totalorder %v2571_v40, 0  ;;  %v983_v13 = vshrl.u32 %v3643_v7, %v982_v50  ;;  %v986_v45 = vor.u32 %v985_v51, %v984_v9 }
  0xd9   :  { %v2195_v25 = vmin.u32 %v930_v39, %v3080_v58  ;;  %v989_v21 = vor.u32 %v988_v54, %v987_v27  ;;  %v992_v6 = vor.u32 %v991_v60, %v990_v26  ;;  %v995_v30 = vor.u32 %v994_v41, %v993_v42 }
  0xda   :  { %v997_v33 = vshrl.u32 %v3640_v1, %v982_v50  ;;  %vm999_vm0 = vcmp.lt.s32.totalorder %v980_v0, 1  ;;  %vm1002_vm1 = vcmp.lt.s32.totalorder %v980_v0, 4  ;;  %v1015_v38 = vshll.u32 %v975_v36, 8 }
  0xdb   :  { %v932_v14 = vclz %v2195_v25  ;;  %v1074_v34 = vshrl.u32 %v1073_v37, 23  ;;  %v3655_v44 = vand.u32 2147483647, %v2571_v40  ;;  %v836_v39 = vor.u32 %v835_v23, %v834_v49 }
  0xdc   :  { %v998_v59 = vor.u32 %v997_v33, %v996_v4  ;;  %vm1001_vm3 = vcmp.lt.s32.totalorder %v980_v0, 3  ;;  %v1004_v9 = vsel %vm1002_vm1, %v992_v6, 2102212464  ;;  %v840_v51 = vor.u32 4788187, %v839_v63 }
  0xdd   :  { %vm3101_vm2 = vcmp.le.f32.partialorder %v3655_v44, 0.7853982  ;;  %v2196_v27 = vadd.s32 4294967294, %v932_v14  ;;  %vm1000_vm4 = vcmp.lt.s32.totalorder %v980_v0, 2  ;;  %v1007_v50 = vsel %vm999_vm0, %v986_v45, %v989_v21 }
  0xde   :  { %v1003_v25 = vsel %vm999_vm0, %v983_v13, %v986_v45  ;;  %v1005_v54 = vsel %vm1001_vm3, %v989_v21, %v1004_v9  ;;  %v1008_v36 = vsel %vm1002_vm1, %v995_v30, 920167782  ;;  %v1011_v26 = vsel %vm999_vm0, %v989_v21, %v992_v6 }
  0xdf   :  { %vm443_vm5 = vcmp.lt.s32.totalorder %v2905_v61, 2  ;;  %vm2197_vm6 = vcmp.lt.s32.totalorder %v2196_v27, 0  ;;  %v1009_v33 = vsel %vm1001_vm3, %v992_v6, %v1008_v36  ;;  %v1012_v60 = vsel %vm1002_vm1, %v998_v59, 1326507024 }
  0xe0   :  { %v2202_v63 = vadd.s32 4294967169, %v1074_v34  ;;  %v742_v14 = vxor.u32 2147483648, %v3076_v55  ;;  %v935_v49 = vsel %vm2197_vm6, 0, %v2196_v27  ;;  %v1010_v42 = vsel %vm1000_vm4, %v1007_v50, %v1009_v33 }
  0xe1   :  { %v1013_v37 = vsel %vm1001_vm3, %v995_v30, %v1012_v60  ;;  %v841_v23 = vand.u32 2147483647, %v840_v51  ;;  %v843_v41 = vcvt.s32.f32 %v836_v39  ;;  %v1006_v4 = vsel %vm1000_vm4, %v1003_v25, %v1005_v54 }
  0xe2   :  { %v1014_v21 = vsel %vm1000_vm4, %v1011_v26, %v1013_v37  ;;  %v3122_v6 = vmul.u32.u64.low %v1015_v38, %v1010_v42  ;;  %v3123_v44 = vmul.u32.u64.high %v1015_v38, %v1010_v42, %v3122_v6  ;;  %v3658_v59 = vxor.u32 2147483648, %v2955_v17 }
  0xe3   :  { %v3119_v13 = vmul.u32.u64.low %v1015_v38, %v1014_v21  ;;  %v3120_v45 = vmul.u32.u64.high %v1015_v38, %v1014_v21, %v3119_v13  ;;  %2315 = vcosq.f32 %v3054_v28  ;;  %v940_v30 = vsub.s32 4294967266, %v935_v49 }
  0xe4   :  { %v446_v34 = vsel %vm444_vm14, %v2935_v19, %v3658_v59  ;;  %v1080_v39 = vadd.s32 1, %v2202_v63  ;;  %2317 = vsinq.f32 %v3054_v28  ;;  %v643_v0 = vsel %vm3006_vm9, %v2483_v5, %v3071_v22 }
  0xe5   :  { %v743_v9 = vsel %vm660_vm15, %v742_v14, %v3076_v55  ;;  %v1070_v51 = vand.u32 2147483647, %v2599_v31  ;;  %v844_v27 = vmul.f32 %v843_v41, %v841_v23  ;;  %v920_v50 = vadd.s32 %v2979_v11, %v2999_v32 }
  0xe6   :  { %v1022_v25 = vmul.u32 %v1015_v38, %v1006_v4  ;;  %vm1081_vm7 = vcmp.gt.s32.totalorder %v1080_v39, 0  ;;  %v3659_v54 = vand.u32 2147483647, %v2581_v56  ;;  %v936_v15 = vsub.s32 32, %v935_v49 }
  0xe7   :  { %vm1024_vm9 = vc.u32 %v3120_v45, %v3122_v6  ;;  %v1025_v22 = vadd.s32 1, %v3123_v44  ;;  %v1082_v55 = vsel %vm1081_vm7, %v1080_v39, 0  ;;  %2319 = vcosq.f32 %v643_v0 }
  0xe8   :  { %vm3145_vm8 = vcmp.le.f32.partialorder %v3659_v54, 0.7853982  ;;  %v746_v11 = vsel %vm3101_vm2, %v2571_v40, %v743_v9  ;;  %v941_v32 = vadd.s32 127, %v940_v30  ;;  %v1084_v38 = vand.u32 31, %v1082_v55 }
  0xe9   :  { %2321 = vsinq.f32 %v643_v0  ;;  %v3156_v36 = vand.u32 3, %v3058_v2  ;;  %vm763_vm10 = vcmp.lt.s32.totalorder %v2581_v56, 0  ;;  %v1026_v26 = vsel %vm1024_vm9, %v1025_v22, %v3123_v44 }
  0xea   :  { %v845_v33 = vxor.u32 2147483648, %v844_v27  ;;  %v1027_v60 = vadd.s32 %v1026_v26, %v1022_v25  ;;  %v1077_v63 = vand.u32 8388607, %v1070_v51  ;;  %v1085_v14 = vsub.s32 32, %v1084_v38 }
  0xeb   :  { %v3165_v42 = vsel %vm443_vm5, %v446_v34, %v3067_v24  ;;  %2323 = vcosq.f32 %v746_v11  ;;  %v937_v37 = vshll.u32 %v3080_v58, %v935_v49  ;;  %v938_v23 = vshrl.u32 %v920_v50, %v936_v15 }
  0xec   :  { %v942_v41 = vshll.u32 %v941_v32, 23  ;;  %v1028_v4 = vadd.s32 536870912, %v1027_v60  ;;  %v1087_v21 = vshll.u32 %v3643_v7, %v1084_v38  ;;  %v1090_v13 = vshll.u32 %v3641_v62, %v1084_v38 }
  0xed   :  { %v1088_v44 = vshrl.u32 %v3641_v62, %v1085_v14  ;;  %v1091_v59 = vshrl.u32 %v3642_v12, %v1085_v14  ;;  %v1096_v30 = vshll.u32 %v3638_v8, %v1084_v38  ;;  %v1097_v61 = vshrl.u32 %v3639_v20, %v1085_v14 }
  0xee   :  { %v846_v24 = vsel %vm763_vm10, %v845_v33, %v844_v27  ;;  %v3176_v34 = vshrl.u32 %v1028_v4, 30  ;;  %v1078_v58 = vor.u32 8388608, %v1077_v63  ;;  %v1083_v49 = vshrl.u32 %v1082_v55, 5 }
  0xef   :  { %v939_v39 = vor.u32 %v938_v23, %v937_v37  ;;  %v1093_v0 = vshll.u32 %v3642_v12, %v1084_v38  ;;  %v1094_v9 = vshrl.u32 %v3638_v8, %v1085_v14  ;;  %v1099_v62 = vshll.u32 %v3639_v20, %v1084_v38 }
  0xf0   :  { %v744_v50 = vsub.s32 4, %v2814_v35  ;;  %2325 = vsinq.f32 %v746_v11  ;;  %v943_v25 = vor.u32 4788187, %v942_v41  ;;  %v1030_v54 = vshll.u32 %v3176_v34, 30  ;;  %v3183_v15 = vpop.eup %2315 }
  0xf1   :  { %v1089_v27 = vor.u32 %v1088_v44, %v1087_v21  ;;  %v1092_v22 = vor.u32 %v1091_v59, %v1090_v13  ;;  %v1098_v32 = vor.u32 %v1097_v61, %v1096_v30  ;;  %v1100_v55 = vshrl.u32 %v3640_v1, %v1085_v14  ;;  %v3186_v26 = vpop.eup %2317 }
  0xf2   :  { %v849_v8 = vsel %vm3145_vm8, %v2581_v56, %v846_v24  ;;  %v3191_v20 = vsub.s32 %v1027_v60, %v1030_v54  ;;  %v1086_v12 = vshrl.u32 %v3643_v7, %v1085_v14  ;;  %vm1102_vm11 = vcmp.lt.s32.totalorder %v1083_v49, 1 }
  0xf3   :  { %v946_v11 = vcvt.s32.f32 %v939_v39  ;;  %v1095_v38 = vor.u32 %v1094_v9, %v1093_v0  ;;  %v1101_v33 = vor.u32 %v1100_v55, %v1099_v62  ;;  %v3194_v63 = vshll.u32 %v1078_v58, 8 }
  0xf4   :  { %vm550_vm12 = vcmp.eq.s32.totalorder %v3046_v10, 2  ;;  %v944_v37 = vand.u32 2147483647, %v943_v25  ;;  %v1033_v1 = vsub.s32 0, %v3191_v20  ;;  %vm1104_vm13 = vcmp.lt.s32.totalorder %v1083_v49, 3  ;;  %v3198_v23 = vpop.eup %2319 }
  0xf5   :  { %vm1105_vm14 = vcmp.lt.s32.totalorder %v1083_v49, 4  ;;  %vm547_vm0 = vcmp.eq.s32.totalorder %v3046_v10, 0  ;;  %vm1103_vm1 = vcmp.lt.s32.totalorder %v1083_v49, 2  ;;  %v1110_v60 = vsel %vm1102_vm11, %v1089_v27, %v1092_v22 }
  0xf6   :  { %v1107_v7 = vsel %vm1105_vm14, %v1095_v38, 2102212464  ;;  %v1111_v14 = vsel %vm1105_vm14, %v1098_v32, 920167782  ;;  %v3204_v41 = vpop.eup %2321  ;;  %v745_v4 = vsel %vm660_vm15, %v744_v50, %v2814_v35  ;;  %2327 = vcosq.f32 %v849_v8 }
  0xf7   :  { %v2199_v21 = vmin.u32 %v1033_v1, %v3191_v20  ;;  %v1106_v13 = vsel %vm1102_vm11, %v1086_v12, %v1089_v27  ;;  %vm653_vm3 = vcmp.eq.s32.totalorder %v3156_v36, 2  ;;  %v1108_v44 = vsel %vm1104_vm13, %v1092_v22, %v1107_v7 }
  0xf8   :  { %v1112_v59 = vsel %vm1104_vm13, %v1095_v38, %v1111_v14  ;;  %v1114_v30 = vsel %vm1102_vm11, %v1092_v22, %v1095_v38  ;;  %v1115_v61 = vsel %vm1105_vm14, %v1101_v33, 1326507024  ;;  %v3216_v24 = vpop.eup %2323  ;;  %vm650_vm4 = vcmp.eq.s32.totalorder %v3156_v36, 0 }
  0xf9   :  { %2329 = vsinq.f32 %v849_v8  ;;  %v1035_v35 = vclz %v2199_v21  ;;  %v1113_v58 = vsel %vm1103_vm1, %v1110_v60, %v1112_v59  ;;  %v1116_v39 = vsel %vm1104_vm13, %v1098_v32, %v1115_v61  ;;  %v3668_v21 = vld [vmem:[#allocation11_spill] sm:$0xff] }
  0xfa   :  { %v947_v0 = vmul.f32 %v946_v11, %v944_v37  ;;  %v1117_v9 = vsel %vm1103_vm1, %v1114_v30, %v1116_v39  ;;  %v3223_v62 = vmul.u32.u64.low %v3194_v63, %v1113_v58  ;;  %v3224_v50 = vmul.u32.u64.high %v3194_v63, %v1113_v58, %v3223_v62 }
  0xfb   :  { %vm441_vm15 = vweird.f32 %v2441_v46  ;;  %v2200_v25 = vadd.s32 4294967294, %v1035_v35  ;;  %v1109_v54 = vsel %vm1103_vm1, %v1106_v13, %v1108_v44  ;;  %vm546_vm5 = vcmp.lt.s32.totalorder %v3046_v10, 2 }
  0xfc   :  { %v3230_v27 = vmul.u32.u64.low %v3194_v63, %v1117_v9  ;;  %v3231_v22 = vmul.u32.u64.high %v3194_v63, %v1117_v9, %v3230_v27  ;;  %v548_v32 = vxor.u32 2147483648, %v3186_v26  ;;  %v551_v55 = vxor.u32 2147483648, %v3183_v15 }
  0xfd   :  { %vm649_vm6 = vcmp.lt.s32.totalorder %v3156_v36, 2  ;;  %v3239_v8 = vsel %vm3101_vm2, 0, %v745_v4  ;;  %vm866_vm7 = vcmp.lt.s32.totalorder %v2592_v52, 0  ;;  %v847_v12 = vsub.s32 4, %v2937_v48  ;;  %v3248_v38 = vpop.eup %2325 }
  0xfe   :  { %v3243_v49 = vand.u32 3, %v3239_v8  ;;  %v1023_v11 = vadd.s32 %v3122_v6, %v3120_v45  ;;  %vm2201_vm9 = vcmp.lt.s32.totalorder %v2200_v25, 0  ;;  %v948_v33 = vxor.u32 2147483648, %v947_v0 }
  0xff   :  { %v1038_v37 = vsel %vm2201_vm9, 0, %v2200_v25  ;;  %v1125_v1 = vmul.u32 %v3194_v63, %v1109_v54  ;;  %v1128_v57 = vadd.s32 1, %v3224_v50  ;;  %v3625_v7 = vxor.u32 2147483648, %v3198_v23 }
 0x100   :  { %v1039_v60 = vsub.s32 32, %v1038_v37  ;;  %v1040_v14 = vshll.u32 %v3191_v20, %v1038_v37  ;;  %v1043_v4 = vsub.s32 4294967266, %v1038_v37  ;;  %vm544_vm2 = vweird.f32 %v2444_v29 }
 0x101   :  { %v552_v45 = vsel %vm550_vm12, %v551_v55, %v3186_v26  ;;  %v3626_v6 = vxor.u32 2147483648, %v3204_v41  ;;  %v3662_v63 = vand.u32 2147483647, %v2592_v52  ;;  %vm1127_vm13 = vc.u32 %v3231_v22, %v3223_v62 }
 0x102   :  { %v549_v20 = vsel %vm547_vm0, %v3183_v15, %v548_v32  ;;  %vm647_vm14 = vweird.f32 %v2483_v5  ;;  %v1041_v13 = vshrl.u32 %v1023_v11, %v1039_v60  ;;  %v1044_v44 = vadd.s32 127, %v1043_v4 }
 0x103   :  { %vm3263_vm11 = vcmp.le.f32.partialorder %v3662_v63, 0.7853982  ;;  %v1129_v59 = vsel %vm1127_vm13, %v1128_v57, %v3224_v50  ;;  %vm753_vm12 = vcmp.eq.s32.totalorder %v3243_v49, 0  ;;  %v848_v30 = vsel %vm763_vm10, %v847_v12, %v2937_v48  ;;  %v3289_v50 = vpop.eup %2327 }
 0x104   :  { %v949_v61 = vsel %vm866_vm7, %v948_v33, %v947_v0  ;;  %v1130_v35 = vadd.s32 %v1129_v59, %v1125_v1  ;;  %v655_v58 = vsel %vm653_vm3, %v3625_v7, %v3204_v41  ;;  %vm3628_vm0 = vweird.f32 %v2571_v40 }
 0x105   :  { %vm756_vm1 = vcmp.eq.s32.totalorder %v3243_v49, 2  ;;  %v1042_v39 = vor.u32 %v1041_v13, %v1040_v14  ;;  %v1045_v9 = vshll.u32 %v1044_v44, 23  ;;  %v652_v48 = vsel %vm650_vm4, %v3198_v23, %v3626_v6 }
 0x106   :  { %v3624_v0 = vxor.u32 2147483648, %v3248_v38  ;;  %v3623_v25 = vxor.u32 2147483648, %v3216_v24  ;;  %v1131_v54 = vadd.s32 536870912, %v1130_v35  ;;  %v3300_v27 = vsel %vm3145_vm8, 0, %v848_v30  ;;  %v3305_v37 = vpop.eup %2329 }
 0x107   :  { %v952_v12 = vsel %vm3263_vm11, %v2592_v52, %v949_v61  ;;  %v1046_v11 = vor.u32 4788187, %v1045_v9  ;;  %v1049_v33 = vcvt.s32.f32 %v1042_v39  ;;  %vm322_vm10 = vcmp.eq.f32.partialorder %v2657_v53, 0.0 }
 0x108   :  { %vm329_vm3 = vcmp.eq.f32.partialorder %v2695_v18, 0.0  ;;  %vm336_vm4 = vcmp.eq.f32.partialorder %v2716_v3, 0.0  ;;  %v451_v28 = vsel %vm441_vm15, nan, %v3165_v42  ;;  %v854_v1 = vand.u32 3, %v3300_v27 }
 0x109   :  { %v950_v57 = vsub.s32 4, %v3048_v16  ;;  %v3315_v60 = vshrl.u32 %v1131_v54, 30  ;;  %v553_v14 = vsel %vm546_vm5, %v549_v20, %v552_v45  ;;  %v656_v4 = vsel %vm649_vm6, %v652_v48, %v655_v58 }
 0x10a   :  { %vm752_vm8 = vcmp.lt.s32.totalorder %v3243_v49, 2  ;;  %v1047_v63 = vand.u32 2147483647, %v1046_v11  ;;  %v755_v42 = vsel %vm753_vm12, %v3216_v24, %v3624_v0  ;;  %v758_v13 = vsel %vm756_vm1, %v3623_v25, %v3248_v38 }
 0x10b   :  { %2331 = vcosq.f32 %v952_v12  ;;  %v1133_v10 = vshll.u32 %v3315_v60, 30  ;;  %v3622_v36 = vxor.u32 2147483648, %v3305_v37  ;;  %v3621_v45 = vxor.u32 2147483648, %v3289_v50 }
 0x10c   :  { %2333 = vsinq.f32 %v952_v12  ;;  %v1050_v20 = vmul.f32 %v1049_v33, %v1047_v63  ;;  %vm856_vm5 = vcmp.eq.s32.totalorder %v854_v1, 0  ;;  %vm859_vm6 = vcmp.eq.s32.totalorder %v854_v1, 2 }
 0x10d   :  { %v951_v44 = vsel %vm866_vm7, %v950_v57, %v3048_v16  ;;  %v3338_v59 = vsub.s32 %v1130_v35, %v1133_v10  ;;  %v554_v49 = vsel %vm544_vm2, nan, %v553_v14  ;;  %v759_v30 = vsel %vm752_vm8, %v755_v42, %v758_v13  ;;  %v3679_v57 = vld [vmem:[#allocation14_spill] sm:$0xff] }
 0x10e   :  { %vm3627_vm9 = vweird.f32 %v2581_v56  ;;  %vm969_vm13 = vcmp.lt.s32.totalorder %v2597_v43, 0  ;;  %v657_v61 = vsel %vm647_vm14, nan, %v656_v4  ;;  %vm855_vm12 = vcmp.lt.s32.totalorder %v854_v1, 2  ;;  %v3669_v4 = vld [vmem:[#allocation12_spill] sm:$0xff] }
 0x10f   :  { %v1051_v58 = vxor.u32 2147483648, %v1050_v20  ;;  %v1136_v39 = vsub.s32 0, %v3338_v59  ;;  %v858_v16 = vsel %vm856_vm5, %v3289_v50, %v3622_v36  ;;  %v861_v35 = vsel %vm859_vm6, %v3621_v45, %v3305_v37 }
 0x110   :  { %v3355_v9 = vsel %vm3263_vm11, 0, %v951_v44  ;;  %v1173_v48 = vmul.f32 %v451_v28, %v2790_v47  ;;  %v760_v54 = vsel %vm3628_vm0, nan, %v759_v30  ;;  %v1053_v11 = vsub.s32 4, %v3176_v34  ;;  %v3670_v44 = vld [vmem:[#allocation16_spill] sm:$0xff] }
 0x111   :  { %v3361_v12 = vand.u32 3, %v3355_v9  ;;  %v2203_v33 = vmin.u32 %v1136_v39, %v3338_v59  ;;  %v3665_v1 = vand.u32 2147483647, %v2597_v43  ;;  %v1174_v14 = vmul.f32 %v554_v49, %v3668_v21  ;;  %v3671_v39 = vld [vmem:[#allocation15_spill] sm:$0xff] }
 0x112   :  { %v1175_v28 = vmul.f32 %v657_v61, %v3669_v4  ;;  %v3376_v63 = vstv %s3592_s1  ;;  %v862_v42 = vsel %vm855_vm12, %v858_v16, %v861_v35  ;;  %v1052_v13 = vsel %vm969_vm13, %v1051_v58, %v1050_v20  ;;  %v3673_v61 = vld [vmem:[#allocation17_spill] sm:$0xff]  ;;  %v3675_v16 = vld [vmem:[#allocation19_spill] sm:$0xff]  ;;  %s2395_s1 = smov [#allocation7]  }
 0x113   :  { %vm3367_vm7 = vcmp.le.f32.partialorder %v3665_v1, 0.7853982  ;;  %v1138_v10 = vclz %v2203_v33  ;;  %v1344_v30 = vadd.s32 3, %v3670_v44  ;;  %v3672_v1 = vand.u32 2147483648, %v2657_v53  ;;  %v3677_v35 = vld [vmem:[#allocation13_spill] sm:$0xff]  ;;  %s2165_s25 = sshll.u32 %s2395_s1, 4  ;;  %s2166_s25 = int_to_ptr.vmem [resolvable:$true] %s2165_s25 }
 0x114   :  { %v3674_v45 = vand.u32 2147483648, %v2695_v18  ;;  %v3676_v20 = vand.u32 2147483648, %v2716_v3  ;;  %v1176_v33 = vmul.f32 %v760_v54, %v3677_v35  ;;  %vm959_vm11 = vcmp.eq.s32.totalorder %v3361_v12, 0  ;;  %s2363_s26 = scalar_lea.vmem %s2166_s25, 256  ;;  %p2368_p6 = scmp.lt.s32.totalorder %s2166_s25, %s2166_s25 }
 0x115   :  { %v3386_v49 = vsel %vm322_vm10, %v3672_v1, %v3671_v39  ;;  %vm962_vm1 = vcmp.eq.s32.totalorder %v3361_v12, 2  ;;  %v1054_v53 = vsel %vm969_vm13, %v1053_v11, %v3176_v34  ;;  %v2204_v18 = vadd.s32 4294967294, %v1138_v10  ;;  %p2364_p5 = scmp.ne.s32.totalorder %s2166_s25, %s2363_s26  ;;  %p2369_p7 = scmp.lt.s32.totalorder %s2363_s26, %s2363_s26 }
 0x116   :  { %v3393_v36 = vsel %vm329_vm3, %v3674_v45, %v3673_v61  ;;  %v3400_v58 = vsel %vm336_vm4, %v3676_v20, %v3675_v16  ;;  %v3409_v45 = vmul.f32 %v3376_v63, %v1173_v48  ;;  %v863_v44 = vsel %vm3627_vm9, nan, %v862_v42  ;;  %v3678_v48 = vld [vmem:[#allocation18_spill] sm:$0xff] }
 0x117   :  { %v1055_v3 = vsel %vm3367_vm7, %v2597_v43, %v1052_v13  ;;  %v3417_v54 = vmul.f32 %v3376_v63, %v1174_v14  ;;  %v3420_v39 = vmul.f32 %v3376_v63, %v1175_v28  ;;  %v1126_v34 = vadd.s32 %v3223_v62, %v3231_v22  ;;  %p2370_p8 = por %p2369_p7, %p2368_p6 }
 0x118   :  { %vm2205_vm10 = vcmp.lt.s32.totalorder %v2204_v18, 0  ;;  %v1345_v11 = vand.u32 3, %v1344_v30  ;;  %v1448_v10 = vadd.s32 3, %v3678_v48  ;;  %v3425_v1 = vpop.eup %2331  ;;  %vm958_vm3 = vcmp.lt.s32.totalorder %v3361_v12, 2 }
 0x119   :  { %v1056_v42 = vsel %vm3367_vm7, 0, %v1054_v53  ;;  %vm1072_vm4 = vcmp.lt.s32.totalorder %v2599_v31, 0  ;;  %v1141_v14 = vsel %vm2205_vm10, 0, %v2204_v18  ;;  %v3432_v28 = vmul.f32 %v3376_v63, %v1176_v33  ;;  %v3436_v62 = vpop.eup %2333  ;;  %p2371_p9 = pnand %p2370_p8, %p2364_p5 }
 0x11a   :  { %v2394_v13 = vmov 1966171168   ;;  %2335 = vcosq.f32 %v1055_v3  ;;  %v1142_v22 = vsub.s32 32, %v1141_v14  ;;  %v1143_v30 = vshll.u32 %v3338_v59, %v1141_v14 }
 0x11b   :  { %v3434_v61 = vunpack.c.l.s4 %v2394_v13  ;;  %v1146_v16 = vsub.s32 4294967266, %v1141_v14  ;;  %2337 = vsinq.f32 %v1055_v3  ;;  %v3439_v20 = vand.u32 3, %v1056_v42 }
 0x11c   :  { %v3442_v53 = vmul.f32 %v863_v44, %v3679_v57  ;;  %v1552_v18 = vadd.s32 3, %v3058_v2  ;;  %vm3447_vm8 = vcmp.le.f32.partialorder %v1070_v51, 0.7853982  ;;  %v1144_v48 = vshrl.u32 %v1126_v34, %v1142_v22 }
 0x11d   :  { %v1147_v13 = vadd.s32 127, %v1146_v16  ;;  %vm1347_vm5 = vcmp.eq.s32.totalorder %v1345_v11, 0  ;;  %v1449_v25 = vand.u32 3, %v1448_v10  ;;  %v960_v59 = vxor.u32 2147483648, %v3436_v62 }
 0x11e   :  { %v963_v3 = vxor.u32 2147483648, %v3425_v1  ;;  %v1656_v44 = vadd.s32 3, %v3239_v8  ;;  %v1145_v0 = vor.u32 %v1144_v48, %v1143_v30  ;;  %v1156_v7 = vsub.s32 4, %v3315_v60 }
 0x11f   :  { %v1148_v2 = vshll.u32 %v1147_v13, 23  ;;  %vm1346_vm6 = vcmp.lt.s32.totalorder %v1345_v11, 2  ;;  %v3682_v51 = vxor.u32 2147483648, %v2955_v17  ;;  %vm1350_vm13 = vcmp.eq.s32.totalorder %v1345_v11, 2 }
 0x120   :  { %v1553_v22 = vand.u32 3, %v1552_v18  ;;  %v1760_v10 = vadd.s32 3, %v3300_v27  ;;  %v1152_v6 = vcvt.s32.f32 %v1145_v0  ;;  %vm1451_vm12 = vcmp.eq.s32.totalorder %v1449_v25, 0 }
 0x121   :  { %v1349_v34 = vsel %vm1347_vm5, %v2935_v19, %v3682_v51  ;;  %v1149_v16 = vor.u32 4788187, %v1148_v2  ;;  %vm1454_vm7 = vcmp.eq.s32.totalorder %v1449_v25, 2  ;;  %v961_v8 = vsel %vm959_vm11, %v3425_v1, %v960_v59 }
 0x122   :  { %v964_v30 = vsel %vm962_vm1, %v963_v3, %v3436_v62  ;;  %v1657_v48 = vand.u32 3, %v1656_v44  ;;  %v1864_v18 = vadd.s32 3, %v3355_v9  ;;  %vm956_vm10 = vweird.f32 %v2592_v52  ;;  %v3693_v52 = vld [vmem:[#allocation10_spill] sm:$0xff] }
 0x123   :  { %v1150_v0 = vand.u32 2147483647, %v1149_v16  ;;  %v1157_v27 = vsel %vm1072_vm4, %v1156_v7, %v3315_v60  ;;  %v3683_v13 = vxor.u32 2147483648, %v2935_v19  ;;  %vm1450_vm11 = vcmp.lt.s32.totalorder %v1449_v25, 2 }
 0x124   :  { %v1453_v51 = vsel %vm1451_vm12, %v3183_v15, %v548_v32  ;;  %v1456_v9 = vsel %vm1454_vm7, %v551_v55, %v3186_v26  ;;  %v1761_v44 = vand.u32 3, %v1760_v10  ;;  %v1968_v14 = vadd.s32 3, %v1056_v42 }
 0x125   :  { %v1352_v2 = vsel %vm1350_vm13, %v3683_v13, %v2955_v17  ;;  %v965_v16 = vsel %vm958_vm3, %v961_v8, %v964_v30  ;;  %vm1062_vm1 = vcmp.eq.s32.totalorder %v3439_v20, 0  ;;  %v1153_v19 = vmul.f32 %v1152_v6, %v1150_v0 }
 0x126   :  { %vm1555_vm13 = vcmp.eq.s32.totalorder %v1553_v22, 0  ;;  %vm1558_vm9 = vcmp.eq.s32.totalorder %v1553_v22, 2  ;;  %v1159_v17 = vsel %vm3447_vm8, 0, %v1157_v27  ;;  %v1353_v32 = vsel %vm1346_vm6, %v1349_v34, %v1352_v2 }
 0x127   :  { %vm1659_vm12 = vcmp.eq.s32.totalorder %v1657_v48, 0  ;;  %v1865_v15 = vand.u32 3, %v1864_v18  ;;  %v1154_v26 = vxor.u32 2147483648, %v1153_v19  ;;  %v1457_v55 = vsel %vm1450_vm11, %v1453_v51, %v1456_v9  ;;  %v2336_v7 = vpop.eup %2335 }
 0x128   :  { %vm1554_vm7 = vcmp.lt.s32.totalorder %v1553_v22, 2  ;;  %vm1662_vm0 = vcmp.eq.s32.totalorder %v1657_v48, 2  ;;  %vm1061_vm3 = vcmp.lt.s32.totalorder %v3439_v20, 2  ;;  %v3684_v60 = vxor.u32 2147483648, %v3204_v41  ;;  %v2338_v34 = vpop.eup %2337 }
 0x129   :  { %v3685_v12 = vxor.u32 2147483648, %v3198_v23  ;;  %vm1763_vm5 = vcmp.eq.s32.totalorder %v1761_v44, 0  ;;  %v1969_v11 = vand.u32 3, %v1968_v14  ;;  %v1155_v25 = vsel %vm1072_vm4, %v1154_v26, %v1153_v19 }
 0x12a   :  { %v1557_v6 = vsel %vm1555_vm13, %v3198_v23, %v3684_v60  ;;  %vm1658_vm6 = vcmp.lt.s32.totalorder %v1657_v48, 2  ;;  %v3686_v10 = vxor.u32 2147483648, %v3248_v38  ;;  %vm1766_vm11 = vcmp.eq.s32.totalorder %v1761_v44, 2 }
 0x12b   :  { %v1560_v42 = vsel %vm1558_vm9, %v3685_v12, %v3204_v41  ;;  %v1158_v30 = vsel %vm3447_vm8, %v2599_v31, %v1155_v25  ;;  %v3687_v23 = vxor.u32 2147483648, %v3216_v24  ;;  %vm1867_vm9 = vcmp.eq.s32.totalorder %v1865_v15, 0 }
 0x12c   :  { %v1661_v8 = vsel %vm1659_vm12, %v3216_v24, %v3686_v10  ;;  %vm1870_vm13 = vcmp.eq.s32.totalorder %v1865_v15, 2  ;;  %2339 = vcosq.f32 %v1158_v30  ;;  %v1561_v14 = vsel %vm1554_vm7, %v1557_v6, %v1560_v42 }
 0x12d   :  { %v1664_v41 = vsel %vm1662_vm0, %v3687_v23, %v3248_v38  ;;  %vm1762_vm4 = vcmp.lt.s32.totalorder %v1761_v44, 2  ;;  %v3688_v48 = vxor.u32 2147483648, %v3305_v37  ;;  %v1063_v0 = vxor.u32 2147483648, %v2338_v34 }
 0x12e   :  { %v1066_v27 = vxor.u32 2147483648, %v2336_v7  ;;  %2341 = vsinq.f32 %v1158_v30  ;;  %v3689_v33 = vxor.u32 2147483648, %v3289_v50  ;;  %v1665_v2 = vsel %vm1658_vm6, %v1661_v8, %v1664_v41 }
 0x12f   :  { %v1765_v18 = vsel %vm1763_vm5, %v3289_v50, %v3688_v48  ;;  %vm1866_vm8 = vcmp.lt.s32.totalorder %v1865_v15, 2  ;;  %v1869_v24 = vsel %vm1867_vm9, %v3425_v1, %v960_v59  ;;  %v1872_v38 = vsel %vm1870_vm13, %v963_v3, %v3436_v62 }
 0x130   :  { %v1768_v13 = vsel %vm1766_vm11, %v3689_v33, %v3305_v37  ;;  %v966_v22 = vsel %vm956_vm10, nan, %v965_v16  ;;  %v1354_v51 = vsel %vm441_vm15, nan, %v1353_v32  ;;  %vm1971_vm0 = vcmp.eq.s32.totalorder %v1969_v11, 0 }
 0x131   :  { %vm1974_vm5 = vcmp.eq.s32.totalorder %v1969_v11, 2  ;;  %v1458_v50 = vsel %vm544_vm2, nan, %v1457_v55  ;;  %v1562_v37 = vsel %vm647_vm14, nan, %v1561_v14  ;;  %v1769_v59 = vsel %vm1762_vm4, %v1765_v18, %v1768_v13 }
 0x132   :  { %v2072_v9 = vadd.s32 3, %v1159_v17  ;;  %v1064_v1 = vsel %vm1062_vm1, %v2336_v7, %v1063_v0  ;;  %vm3690_vm12 = vcmp.eq.s32.totalorder %v3439_v20, 2  ;;  %vm3691_vm7 = vweird.f32 %v2571_v40 }
 0x133   :  { %v1067_v62 = vsel %vm3690_vm12, %v1066_v27, %v2338_v34  ;;  %v1666_v46 = vsel %vm3691_vm7, nan, %v1665_v2  ;;  %v1873_v3 = vsel %vm1866_vm8, %v1869_v24, %v1872_v38  ;;  %v1178_v16 = vmul.f32 %v966_v22, %v3386_v49 }
 0x134   :  { %vm1970_vm15 = vcmp.lt.s32.totalorder %v1969_v11, 2  ;;  %v1973_v29 = vsel %vm1971_vm0, %v2336_v7, %v1063_v0  ;;  %v1976_v19 = vsel %vm1974_vm5, %v1066_v27, %v2338_v34  ;;  %vm1059_vm2 = vweird.f32 %v2597_v43 }
 0x135   :  { %vm3692_vm14 = vweird.f32 %v2581_v56  ;;  %v2083_v44 = vmul.f32 %v1354_v51, %v2790_v47  ;;  %v2084_v32 = vmul.f32 %v1458_v50, %v3668_v21  ;;  %v1068_v15 = vsel %vm1061_vm3, %v1064_v1, %v1067_v62 }
 0x136   :  { %v1770_v5 = vsel %vm3692_vm14, nan, %v1769_v59  ;;  %vm1162_vm1 = vweird.f32 %v2599_v31  ;;  %v1874_v40 = vsel %vm956_vm10, nan, %v1873_v3  ;;  %v2085_v26 = vmul.f32 %v1562_v37, %v3669_v4 }
 0x137   :  { %v2086_v55 = vmul.f32 %v1666_v46, %v3677_v35  ;;  %v1163_v7 = vand.u32 3, %v1159_v17  ;;  %v1198_v56 = vcombine.low %v3409_v45, %v3417_v54  ;;  %v1977_v60 = vsel %vm1970_vm15, %v1973_v29, %v1976_v19 }
 0x138   :  { %v2073_v47 = vand.u32 3, %v2072_v9  ;;  %v1186_v21 = vmul.f32 %v3376_v63, %v3442_v53  ;;  %v1187_v20 = vmul.f32 %v3376_v63, %v1178_v16  ;;  %v1199_v6 = vcombine.low %v3420_v39, %v3432_v28 }
 0x139   :  { %v3694_v12 = vunpack.c.0.s8 %v3434_v61  ;;  %v1069_v35 = vsel %vm1059_vm2, nan, %v1068_v15  ;;  %v2087_v17 = vmul.f32 %v1770_v5, %v3679_v57  ;;  %v2088_v45 = vmul.f32 %v1874_v40, %v3386_v49  ;;  %v2340_v61 = vpop.eup %2339 }
 0x13a   :  { %v2091_v54 = vmul.f32 %v2083_v44, %v3376_v63  ;;  %v1978_v53 = vsel %vm1059_vm2, nan, %v1977_v60  ;;  %v2092_v42 = vmul.f32 %v2084_v32, %v3376_v63  ;;  %v2093_v39 = vmul.f32 %v2085_v26, %v3376_v63 }
 0x13b   :  { %v1207_v4 = vsub.s32 %v3694_v12, %v3693_v52  ;;  %v2094_v28 = vmul.f32 %v2086_v55, %v3376_v63  ;;  %vm1164_vm10 = vcmp.lt.s32.totalorder %v1163_v7, 2  ;;  %vm1165_vm3 = vcmp.eq.s32.totalorder %v1163_v7, 0  ;;  %v2342_v11 = vpop.eup %2341  ;;  %v348_v55 = vld [vmem:[#allocation4] sm:$0xff] }
 0x13c   :  { %vm1168_vm6 = vcmp.eq.s32.totalorder %v1163_v7, 2  ;;  %vm2078_vm11 = vcmp.eq.s32.totalorder %v2073_v47, 2  ;;  %v1169_v57 = vxor.u32 2147483648, %v2340_v61  ;;  %v1179_v49 = vmul.f32 %v1069_v35, %v3393_v36  ;;  %v1250_v7 = vld [vmem:[#allocation4 + $0x8] sm:$0xff] }
 0x13d   :  { %vm2074_vm9 = vcmp.lt.s32.totalorder %v2073_v47, 2  ;;  %vm2075_vm13 = vcmp.eq.s32.totalorder %v2073_v47, 0  ;;  %v1166_v34 = vxor.u32 2147483648, %v2342_v11  ;;  %v2089_v43 = vmul.f32 %v1978_v53, %v3393_v36 }
 0x13e   :  { %v2095_v25 = vmul.f32 %v2087_v17, %v3376_v63  ;;  %v2096_v10 = vmul.f32 %v2088_v45, %v3376_v63  ;;  %v1170_v8 = vsel %vm1168_vm6, %v1169_v57, %v2342_v11  ;;  %v2080_v30 = vsel %vm2078_vm11, %v1169_v57, %v2342_v11 }
 0x13f   :  { %v2107_v23 = vcombine.low %v2091_v54, %v2092_v42  ;;  %v2108_v41 = vcombine.low %v2093_v39, %v2094_v28  ;;  %v1167_v14 = vsel %vm1165_vm3, %v2340_v61, %v1166_v34  ;;  %v1208_v48 = vrot.slane %v1198_v56, %v1207_v4 }
 0x140   :  { %v1215_v18 = vrot.slane %v1199_v6, %v1207_v4  ;;  %v2077_v0 = vsel %vm2075_vm13, %v2340_v61, %v1166_v34  ;;  %v1171_v27 = vsel %vm1164_vm10, %v1167_v14, %v1170_v8  ;;  %v1188_v33 = vmul.f32 %v3376_v63, %v1179_v49 }
 0x141   :  { %v1200_v13 = vcombine.low %v1186_v21, %v1187_v20  ;;  %v2081_v36 = vsel %vm2074_vm9, %v2077_v0, %v2080_v30  ;;  %v1172_v2 = vsel %vm1162_vm1, nan, %v1171_v27  ;;  %v2097_v38 = vmul.f32 %v2089_v43, %v3376_v63 }
 0x142   :  { %v2082_v24 = vsel %vm1162_vm1, nan, %v2081_v36  ;;  %v2109_v22 = vcombine.low %v2095_v25, %v2096_v10  ;;  %v1180_v51 = vmul.f32 %v1172_v2, %v3400_v58  ;;  %v2117_v37 = vrot.slane %v2107_v23, %v1207_v4 }
 0x143   :  { %v2090_v50 = vmul.f32 %v2082_v24, %v3400_v58  ;;  %v2124_v59 = vrot.slane %v2108_v41, %v1207_v4  ;;  %v1222_v62 = vrot.slane %v1200_v13, %v1207_v4  ;;  %v1230_v46 = vcombine.low %v1208_v48, %v1215_v18 }
 0x144   :  { %v1189_v9 = vmul.f32 %v3376_v63, %v1180_v51  ;;  %v2131_v29 = vrot.slane %v2109_v22, %v1207_v4 }
 0x145   :  { %v2098_v1 = vmul.f32 %v2090_v50, %v3376_v63  ;;  %v2139_v31 = vcombine.low %v2117_v37, %v2124_v59  ;;  %v1238_v32 = vrot.slane %v1230_v46, %v1207_v4 }
 0x146   :  { %v1201_v3 = vcombine.low %v1188_v33, %v1189_v9 }
 0x147   :  { %v2110_v16 = vcombine.low %v2097_v38, %v2098_v1  ;;  %v2147_v40 = vrot.slane %v2139_v31, %v1207_v4 }
 0x148   :  { %v1229_v19 = vrot.slane %v1201_v3, %v1207_v4 }
 0x149   :  { %v2138_v5 = vrot.slane %v2110_v16, %v1207_v4 }
 0x14a   :  { %v1231_v44 = vcombine.low %v1222_v62, %v1229_v19 }
 0x14b   :  { %v2140_v15 = vcombine.low %v2131_v29, %v2138_v5 }
 0x14c   :  { %v1245_v26 = vrot.slane %v1231_v44, %v1207_v4 }
 0x14d   :  { %v2154_v58 = vrot.slane %v2140_v15, %v1207_v4 }
 0x14e   :  { %v1246_v56 = vcombine.low %v1238_v32, %v1245_v26 }
 0x14f   :  { %v2155_v63 = vcombine.low %v2147_v40, %v2154_v58 }
 0x150   :  { %v1248_v60 = vadd.f32 %v1246_v56, %v348_v55 }
 0x151   :  { %v2157_v47 = vadd.f32 %v2155_v63, %v1250_v7 }
 0x152   :  { %1249 = vst [vmem:[#allocation7] sm:$0xff] %v1248_v60 }
 0x153   :  { %2158 = vst [vmem:[#allocation7 + $0x8] sm:$0xff] %v2157_v47 }
 0x154   :  { %2374 = shalt.err (!%p2371_p9)
}
 0x155   :  { %2168 = dma.vmem_to_hbm [thread:$0]  %s2166_s25, 256, %s3594_s3, [#allocation6]  }
 0x156   :  { %2385 = dma.done.wait [#allocation6], 256  }
 0x157   :  { %2386 = vsyncadd [#allocation6], 4294967040 }
 0x158   :  { %2172 = vsyncpa [#allocation5], 1 }
 0x159   :  { %2173 = vsyncpa [#allocation6], 1 }

</bundles_post_ra>
